<compile_context>
chip_gen: v6e
topology: v6e:2x2x1
jax: 0.10.0
libtpu: 0.0.40
codegen_flags: <defaults>
</compile_context>

<pallas_src>
import functools

import jax
import jax.numpy as jnp
from jax.experimental import pallas as pl
from jax.experimental.pallas import tpu as pltpu


def _round_up(x, m):
    return (x + m - 1) // m * m


def _mixer_kernel(n_agents, E, EP, HHP, NEP, mm_dtype, use_roll_tree,
                  qs_ref, st_ref,
                  w1f_ref, b1f_ref,        # fused first layer  (S, HHP + 2*EP)
                  w2f_ref, b2f_ref,        # fused second layer (HHP, NEP + EP)
                  rep_ref,                 # (N, NEP) 0/1 agent replication matrix
                  wv2_ref, bv2_ref,        # V second layer row (1, EP); scalar SMEM
                  out_ref):
    st = st_ref[...]                       # (TB, S), already mm_dtype
    qs = qs_ref[...]                       # (TB, N), f32

    # ---- fused first layer: columns [h|hf (2H, padded to HHP) | v1 (EP) | b1 (EP)]
    z = jnp.dot(st, w1f_ref[...], preferred_element_type=jnp.float32) + b1f_ref[...]
    h2_in = jnp.maximum(z[:, :HHP], 0.0)                   # relu([h | hf]), f32
    v1 = jnp.maximum(z[:, HHP:HHP + EP], 0.0)              # relu(V first layer)
    b1 = z[:, HHP + EP:HHP + 2 * EP]                       # hyper_b_1 (no activation)

    # ---- fused second hyper-net layer: [per-agent w1 packed @ E stride | w_final]
    w2 = jnp.abs(jnp.dot(h2_in.astype(mm_dtype), w2f_ref[...],
                         preferred_element_type=jnp.float32) + b2f_ref[...])
    w1a = w2[:, :NEP]                                      # packed per-agent w1
    wf = w2[:, NEP:NEP + EP]                               # w_final (zeros beyond E)

    # ---- lane-replicate agent q-values via an exact f32 0/1 matmul
    qrep = jnp.dot(qs, rep_ref[...], preferred_element_type=jnp.float32)  # (TB, NEP)
    prod = qrep * w1a                                      # exactly 0 beyond N*E lanes

    if use_roll_tree:
        # Cyclic binary roll tree over the E-strided agent groups.  With the
        # complete tree and zero-padded extra groups, lanes [0,E) end up with
        # the sum over all agents regardless of rotation direction.
        half = NEP // 2
        while half >= E:
            prod = prod + pltpu.roll(prod, shift=half, axis=1)
            half //= 2
        hidden = prod[:, :EP] + b1          # lanes >= E hold junk * exactly-0 wf
        hidden = jnp.where(hidden > 0, hidden,
                           jnp.exp(jnp.minimum(hidden, 0.0)) - 1.0)   # ELU(alpha=1)
        total = hidden * wf + v1 * wv2_ref[...]                       # (TB, EP)
    else:
        red = prod[:, 0:E]
        for n in range(1, n_agents):
            red = red + prod[:, n * E:(n + 1) * E]
        hidden = red + b1[:, :E]
        hidden = jnp.where(hidden > 0, hidden,
                           jnp.exp(jnp.minimum(hidden, 0.0)) - 1.0)
        total = hidden * wf[:, :E] + v1[:, :E] * wv2_ref[:, :E]       # (TB, E)

    # ---- lane reduce first (XLU over one slab), then a tiny (TB,1)->(1,TB) relayout
    y = jnp.sum(total, axis=-1, keepdims=True) + bv2_ref[0, 0]        # (TB, 1)
    out_ref[...] = y.T.astype(out_ref.dtype)


def prepare_mixer_params(raw_params, n_agents, state_dim, embed_dim,
                         hypernet_embed, matmul_dtype=jnp.bfloat16):
    """Fuse / pack the raw (in,out)-layout linears into MXU-friendly operands."""
    (w1h, b1h, w1o, b1o, wb1, bb1, wfh, bfh, wfo, bfo,
     wv1, bv1, wv2, bv2) = raw_params
    N, S, E, H = n_agents, state_dim, embed_dim, hypernet_embed
    EP = _round_up(E, 128)
    HHP = _round_up(2 * H, 128)        # contraction width of the 2nd fused matmul
    NEP = _round_up(N * E, 128)        # packed per-agent output width
    C1 = HHP + 2 * EP
    C2 = NEP + EP
    mm_dtype = jnp.dtype(matmul_dtype)

    # fused first layer: [h (H) | hf (H) | pad to HHP | v1 (E..EP) | b1 (E..EP)]
    w1f = jnp.zeros((S, C1), jnp.float32)
    b1f = jnp.zeros((1, C1), jnp.float32)
    w1f = w1f.at[:, 0:H].set(w1h)
    b1f = b1f.at[:, 0:H].set(b1h)
    w1f = w1f.at[:, H:2 * H].set(wfh)
    b1f = b1f.at[:, H:2 * H].set(bfh)
    w1f = w1f.at[:, HHP:HHP + E].set(wv1)
    b1f = b1f.at[:, HHP:HHP + E].set(bv1)
    w1f = w1f.at[:, HHP + EP:HHP + EP + E].set(wb1)
    b1f = b1f.at[:, HHP + EP:HHP + EP + E].set(bb1)

    # fused second layer: rows [h (H) | hf (H) | pad]; cols [agent-packed w1 | w_final]
    w2f = jnp.zeros((HHP, C2), jnp.float32)
    b2f = jnp.zeros((1, C2), jnp.float32)
    w1o_r = w1o.reshape(H, N, E)
    b1o_r = b1o.reshape(1, N, E)
    for n in range(N):
        w2f = w2f.at[0:H, n * E:(n + 1) * E].set(w1o_r[:, n, :])
        b2f = b2f.at[:, n * E:(n + 1) * E].set(b1o_r[:, n, :])
    w2f = w2f.at[H:2 * H, NEP:NEP + E].set(wfo)
    b2f = b2f.at[:, NEP:NEP + E].set(bfo)

    # 0/1 replication matrix: agent n -> lanes [n*E, (n+1)*E)
    rep = jnp.zeros((N, NEP), jnp.float32)
    for n in range(N):
        rep = rep.at[n, n * E:(n + 1) * E].set(1.0)

    wv2r = jnp.zeros((1, EP), jnp.float32).at[:, 0:E].set(wv2.reshape(1, E))
    bv2s = bv2.reshape(1, 1).astype(jnp.float32)

    groups = NEP // E if NEP % E == 0 else 0
    use_roll_tree = groups >= 1 and (groups & (groups - 1)) == 0

    return dict(w1f=w1f.astype(mm_dtype), b1f=b1f,
                w2f=w2f.astype(mm_dtype), b2f=b2f,
                rep=rep, wv2r=wv2r, bv2=bv2s,
                N=N, S=S, E=E, EP=EP, HHP=HHP, NEP=NEP, C1=C1, C2=C2,
                mm_dtype=mm_dtype, use_roll_tree=use_roll_tree)


def mixer_forward(agent_qs, states, fused, block_b=2048):
    """agent_qs: (B, N) f32, states: (B, S) f32 -> q_tot: (B,) f32."""
    assert block_b % 128 == 0 and block_b >= 128
    B, N = agent_qs.shape
    S = states.shape[1]
    assert N == fused["N"] and S == fused["S"]
    E, EP, HHP, NEP = fused["E"], fused["EP"], fused["HHP"], fused["NEP"]
    C1, C2 = fused["C1"], fused["C2"]
    mm_dtype = fused["mm_dtype"]

    # Stream the large per-batch operand in the matmul dtype (halves HBM bytes
    # in bf16 mode); agent_qs stays f32 so the replication matmul is exact.
    states = states.astype(mm_dtype)
    agent_qs = agent_qs.astype(jnp.float32)

    # TB: multiple of 128 (lane-dense output stores); prefer >= 2 grid steps so
    # both v7x TensorCores get work; capped by block_b (per-step VMEM budget).
    TB = min(block_b, max(128, _round_up(-(-B // 2), 128)))
    B_pad = _round_up(B, TB)
    if B_pad != B:
        agent_qs = jnp.pad(agent_qs, ((0, B_pad - B), (0, 0)))
        states = jnp.pad(states, ((0, B_pad - B), (0, 0)))
    grid = (B_pad // TB,)

    def const_spec(shape):
        return pl.BlockSpec(shape, lambda i: (0, 0))

    in_specs = [
        pl.BlockSpec((TB, N), lambda i: (i, 0)),             # agent_qs tile
        pl.BlockSpec((TB, S), lambda i: (i, 0)),             # states tile
        const_spec((S, C1)),                                  # fused layer-1 weight
        const_spec((1, C1)),                                  # fused layer-1 bias
        const_spec((HHP, C2)),                                # fused layer-2 weight
        const_spec((1, C2)),                                  # fused layer-2 bias
        const_spec((N, NEP)),                                 # agent replication 0/1
        const_spec((1, EP)),                                  # wv2 row
        pl.BlockSpec(memory_space=pltpu.MemorySpace.SMEM),    # bv2 scalar
    ]
    out_specs = pl.BlockSpec((1, TB), lambda i: (0, i))

    wbytes = sum(int(fused[k].size) * fused[k].dtype.itemsize
                 for k in ("w1f", "b1f", "w2f", "b2f", "rep", "wv2r", "bv2"))
    cost = pl.CostEstimate(
        flops=int(2 * B_pad * (S * C1 + HHP * C2 + N * NEP) + 8 * B_pad * EP),
        transcendentals=int(B_pad * EP),
        bytes_accessed=int(B_pad * (S * states.dtype.itemsize + 4 * N + 4) + wbytes),
    )

    kernel = functools.partial(
        _mixer_kernel, N, E, EP, HHP, NEP, mm_dtype, fused["use_roll_tree"])

    out = pl.pallas_call(
        kernel,
        grid=grid,
        in_specs=in_specs,
        out_specs=out_specs,
        out_shape=jax.ShapeDtypeStruct((1, B_pad), jnp.float32),
        compiler_params=pltpu.CompilerParams(
            dimension_semantics=("parallel",),
            vmem_limit_bytes=48 * 1024 * 1024),
        cost_estimate=cost,
    )(agent_qs, states, fused["w1f"], fused["b1f"], fused["w2f"],
      fused["b2f"], fused["rep"], fused["wv2r"], fused["bv2"])
    return out[0, :B]


def _init_linear(key, fan_in, fan_out):
    # deterministic PyTorch-style uniform(-1/sqrt(fan_in), 1/sqrt(fan_in))
    kw, kb = jax.random.split(key)
    bound = 1.0 / (fan_in ** 0.5)
    w = jax.random.uniform(kw, (fan_in, fan_out), jnp.float32, -bound, bound)
    b = jax.random.uniform(kb, (1, fan_out), jnp.float32, -bound, bound)
    return w, b


def _reference(agent_qs, states, raw_params, n_agents, embed_dim,
               mm_dtype=jnp.float32):
    """Pure-JAX port of Mixer.forward; mm_dtype emulates the kernel's MXU cast."""
    (w1h, b1h, w1o, b1o, wb1, bb1, wfh, bfh, wfo, bfo,
     wv1, bv1, wv2, bv2) = raw_params

    def mm(x, w):
        return jnp.dot(x.astype(mm_dtype), w.astype(mm_dtype),
                       preferred_element_type=jnp.float32)

    h = jnp.maximum(mm(states, w1h) + b1h, 0.0)
    hf = jnp.maximum(mm(states, wfh) + bfh, 0.0)
    v1r = jnp.maximum(mm(states, wv1) + bv1, 0.0)
    b1 = mm(states, wb1) + bb1
    w1 = jnp.abs(mm(h, w1o) + b1o).reshape(-1, n_agents, embed_dim)
    wf = jnp.abs(mm(hf, wfo) + bfo)
    # V second layer and the agent contraction stay f32/elementwise (as in the kernel).
    v = jnp.sum(v1r * wv2[:, 0][None, :], axis=-1, keepdims=True) + bv2
    hidden = jax.nn.elu(jnp.sum(agent_qs[:, :, None] * w1, axis=1) + b1)
    y = jnp.sum(hidden * wf, axis=-1, keepdims=True) + v
    return y[:, 0]


if __name__ == "__main__":
    B = 256          # batch (B = batch*time in DI-engine usage)
    N = 4            # agent_num
    S = 32           # state_dim
    E = 32           # mixing_embed_dim
    H = 64           # hypernet_embed

    key = jax.random.PRNGKey(0)
    keys = jax.random.split(key, 9)

    # hyper_w_1: S->H->E*N ; hyper_w_final: S->H->E ; hyper_b_1: S->E ; V: S->E->1
    w1h, b1h = _init_linear(keys[0], S, H)
    w1o, b1o = _init_linear(keys[1], H, E * N)
    wfh, bfh = _init_linear(keys[2], S, H)
    wfo, bfo = _init_linear(keys[3], H, E)
    wb1, bb1 = _init_linear(keys[4], S, E)
    wv1, bv1 = _init_linear(keys[5], S, E)
    wv2, bv2 = _init_linear(keys[6], E, 1)
    raw_params = (w1h, b1h, w1o, b1o, wb1, bb1, wfh, bfh, wfo, bfo,
                  wv1, bv1, wv2, bv2)

    agent_qs = jax.random.normal(keys[7], (B, N), jnp.float32)
    states = jax.random.normal(keys[8], (B, S), jnp.float32)

    ref_f32 = _reference(agent_qs, states, raw_params, N, E)

    # f32-MXU mode: validates the packed/fused kernel structure bit-close.
    fused_f32 = prepare_mixer_params(raw_params, N, S, E, H,
                                     matmul_dtype=jnp.float32)
    q_f32 = jax.block_until_ready(
        mixer_forward(agent_qs, states, fused_f32, block_b=128))
    assert q_f32.shape == (B,)
    assert jnp.allclose(q_f32, ref_f32, atol=2e-3, rtol=2e-3)

    # bf16-MXU mode (default fast path): compare against a bf16-emulating
    # reference so the tolerance stays tight while exercising the perf path.
    fused_bf16 = prepare_mixer_params(raw_params, N, S, E, H,
                                      matmul_dtype=jnp.bfloat16)
    q_bf16 = jax.block_until_ready(mixer_forward(agent_qs, states, fused_bf16))
    ref_bf16 = _reference(agent_qs, states, raw_params, N, E,
                          mm_dtype=jnp.bfloat16)
    assert q_bf16.shape == (B,)
    assert jnp.allclose(q_bf16, ref_bf16, atol=1e-2, rtol=1e-2)

    print("KERNEL_OK")
</pallas_src>

<mosaic_0001>
module attributes {stable_mosaic.version = 11 : i64} {
  func.func @_mixer_kernel(%arg0: i32, %arg1: memref<128x4xf32, #tpu.memory_space<vmem>>, %arg2: memref<128x32xf32, #tpu.memory_space<vmem>>, %arg3: memref<32x384xf32, #tpu.memory_space<vmem>>, %arg4: memref<1x384xf32, #tpu.memory_space<vmem>>, %arg5: memref<128x256xf32, #tpu.memory_space<vmem>>, %arg6: memref<1x256xf32, #tpu.memory_space<vmem>>, %arg7: memref<4x128xf32, #tpu.memory_space<vmem>>, %arg8: memref<1x128xf32, #tpu.memory_space<vmem>>, %arg9: memref<1x1xf32, #tpu.memory_space<smem>>, %arg10: memref<1x128xf32, #tpu.memory_space<vmem>>) attributes {dimension_semantics = [#tpu.dimension_semantics<parallel>], iteration_bounds = array<i64: 2>, scalar_prefetch = 0 : i64, scratch_operands = 0 : i64, tpu.core_type = #tpu.core_type<tc>, window_params = [{transform_indices = @transform_0, window_bounds = array<i64: 128, 4>}, {transform_indices = @transform_1, window_bounds = array<i64: 128, 32>}, {pipeline_mode = #tpu.pipeline_mode<synchronous>, transform_indices = @transform_2, window_bounds = array<i64: 32, 384>}, {pipeline_mode = #tpu.pipeline_mode<synchronous>, transform_indices = @transform_3, window_bounds = array<i64: 1, 384>}, {pipeline_mode = #tpu.pipeline_mode<synchronous>, transform_indices = @transform_4, window_bounds = array<i64: 128, 256>}, {pipeline_mode = #tpu.pipeline_mode<synchronous>, transform_indices = @transform_5, window_bounds = array<i64: 1, 256>}, {pipeline_mode = #tpu.pipeline_mode<synchronous>, transform_indices = @transform_6, window_bounds = array<i64: 4, 128>}, {pipeline_mode = #tpu.pipeline_mode<synchronous>, transform_indices = @transform_7, window_bounds = array<i64: 1, 128>}, {transform_indices = @transform_8, window_bounds = array<i64: 1, 1>}, {transform_indices = @transform_9, window_bounds = array<i64: 1, 128>}]} {
    %c0 = arith.constant 0 : index
    %c0_0 = arith.constant 0 : index
    %0 = vector.load %arg2[%c0, %c0_0] : memref<128x32xf32, #tpu.memory_space<vmem>>, vector<128x32xf32>
    %c0_1 = arith.constant 0 : index
    %c0_2 = arith.constant 0 : index
    %1 = vector.load %arg1[%c0_1, %c0_2] : memref<128x4xf32, #tpu.memory_space<vmem>>, vector<128x4xf32>
    %c0_3 = arith.constant 0 : index
    %c0_4 = arith.constant 0 : index
    %2 = vector.load %arg3[%c0_3, %c0_4] : memref<32x384xf32, #tpu.memory_space<vmem>>, vector<32x384xf32>
    %cst = arith.constant dense<0.000000e+00> : vector<128x384xf32>
    %3 = tpu.matmul %0, %2, %cst {dimension_numbers = #tpu.dot_dimension_numbers<[1], [0], [0], [1], [0, 0, 1, 1], [], []>} : vector<128x32xf32>, vector<32x384xf32>, vector<128x384xf32> -> vector<128x384xf32>
    %c0_5 = arith.constant 0 : index
    %c0_6 = arith.constant 0 : index
    %4 = vector.load %arg4[%c0_5, %c0_6] : memref<1x384xf32, #tpu.memory_space<vmem>>, vector<1x384xf32>
    %5 = vector.broadcast %4 : vector<1x384xf32> to vector<128x384xf32>
    %6 = arith.addf %3, %5 : vector<128x384xf32>
    %7 = vector.extract_strided_slice %6 {offsets = [0, 0], sizes = [128, 128], strides = [1, 1]} : vector<128x384xf32> to vector<128x128xf32>
    %cst_7 = arith.constant 0.000000e+00 : f32
    %8 = vector.broadcast %cst_7 : f32 to vector<128x128xf32>
    %9 = arith.maximumf %7, %8 : vector<128x128xf32>
    %10 = vector.extract_strided_slice %6 {offsets = [0, 128], sizes = [128, 128], strides = [1, 1]} : vector<128x384xf32> to vector<128x128xf32>
    %cst_8 = arith.constant 0.000000e+00 : f32
    %11 = vector.broadcast %cst_8 : f32 to vector<128x128xf32>
    %12 = arith.maximumf %10, %11 : vector<128x128xf32>
    %13 = vector.extract_strided_slice %6 {offsets = [0, 256], sizes = [128, 128], strides = [1, 1]} : vector<128x384xf32> to vector<128x128xf32>
    %c0_9 = arith.constant 0 : index
    %c0_10 = arith.constant 0 : index
    %14 = vector.load %arg5[%c0_9, %c0_10] : memref<128x256xf32, #tpu.memory_space<vmem>>, vector<128x256xf32>
    %cst_11 = arith.constant dense<0.000000e+00> : vector<128x256xf32>
    %15 = tpu.matmul %9, %14, %cst_11 {dimension_numbers = #tpu.dot_dimension_numbers<[1], [0], [0], [1], [0, 0, 1, 1], [], []>} : vector<128x128xf32>, vector<128x256xf32>, vector<128x256xf32> -> vector<128x256xf32>
    %c0_12 = arith.constant 0 : index
    %c0_13 = arith.constant 0 : index
    %16 = vector.load %arg6[%c0_12, %c0_13] : memref<1x256xf32, #tpu.memory_space<vmem>>, vector<1x256xf32>
    %17 = vector.broadcast %16 : vector<1x256xf32> to vector<128x256xf32>
    %18 = arith.addf %15, %17 : vector<128x256xf32>
    %19 = math.absf %18 : vector<128x256xf32>
    %20 = vector.extract_strided_slice %19 {offsets = [0, 0], sizes = [128, 128], strides = [1, 1]} : vector<128x256xf32> to vector<128x128xf32>
    %21 = vector.extract_strided_slice %19 {offsets = [0, 128], sizes = [128, 128], strides = [1, 1]} : vector<128x256xf32> to vector<128x128xf32>
    %c0_14 = arith.constant 0 : index
    %c0_15 = arith.constant 0 : index
    %22 = vector.load %arg7[%c0_14, %c0_15] : memref<4x128xf32, #tpu.memory_space<vmem>>, vector<4x128xf32>
    %cst_16 = arith.constant dense<0.000000e+00> : vector<128x128xf32>
    %23 = tpu.matmul %1, %22, %cst_16 {dimension_numbers = #tpu.dot_dimension_numbers<[1], [0], [0], [1], [0, 0, 1, 1], [], []>} : vector<128x4xf32>, vector<4x128xf32>, vector<128x128xf32> -> vector<128x128xf32>
    %24 = arith.mulf %23, %20 : vector<128x128xf32>
    %c64_i32 = arith.constant 64 : i32
    %25 = tpu.dynamic_rotate %24 by %c64_i32 dim 1 : vector<128x128xf32>, i32 -> vector<128x128xf32>
    %26 = arith.addf %24, %25 : vector<128x128xf32>
    %c32_i32 = arith.constant 32 : i32
    %27 = tpu.dynamic_rotate %26 by %c32_i32 dim 1 : vector<128x128xf32>, i32 -> vector<128x128xf32>
    %28 = arith.addf %26, %27 : vector<128x128xf32>
    %29 = arith.addf %28, %13 : vector<128x128xf32>
    %cst_17 = arith.constant 0.000000e+00 : f32
    %30 = vector.broadcast %cst_17 : f32 to vector<128x128xf32>
    %31 = arith.cmpf ogt, %29, %30 : vector<128x128xf32>
    %cst_18 = arith.constant 0.000000e+00 : f32
    %32 = vector.broadcast %cst_18 : f32 to vector<128x128xf32>
    %33 = arith.minimumf %29, %32 : vector<128x128xf32>
    %34 = math.exp %33 : vector<128x128xf32>
    %cst_19 = arith.constant 1.000000e+00 : f32
    %35 = vector.broadcast %cst_19 : f32 to vector<128x128xf32>
    %36 = arith.subf %34, %35 : vector<128x128xf32>
    %37 = arith.select %31, %29, %36 : vector<128x128xi1>, vector<128x128xf32>
    %38 = arith.mulf %37, %21 : vector<128x128xf32>
    %c0_20 = arith.constant 0 : index
    %c0_21 = arith.constant 0 : index
    %39 = vector.load %arg8[%c0_20, %c0_21] : memref<1x128xf32, #tpu.memory_space<vmem>>, vector<1x128xf32>
    %40 = vector.broadcast %39 : vector<1x128xf32> to vector<128x128xf32>
    %41 = arith.mulf %12, %40 : vector<128x128xf32>
    %42 = arith.addf %38, %41 : vector<128x128xf32>
    %cst_22 = arith.constant dense<0.000000e+00> : vector<128xf32>
    %43 = vector.multi_reduction <add>, %42, %cst_22 [1] : vector<128x128xf32> to vector<128xf32>
    %44 = vector.shape_cast %43 : vector<128xf32> to vector<128x1xf32>
    %c0_23 = arith.constant 0 : index
    %c0_24 = arith.constant 0 : index
    %45 = memref.load %arg9[%c0_23, %c0_24] : memref<1x1xf32, #tpu.memory_space<smem>>
    %46 = vector.broadcast %45 : f32 to vector<128x1xf32>
    %47 = arith.addf %44, %46 : vector<128x1xf32>
    %48 = tpu.transpose %47, [1, 0] : vector<128x1xf32> -> vector<1x128xf32>
    %c0_25 = arith.constant 0 : index
    %c0_26 = arith.constant 0 : index
    %49 = vector.load %arg10[%c0_25, %c0_26] : memref<1x128xf32, #tpu.memory_space<vmem>>, vector<1x128xf32>
    tpu.vector_store %arg10[%c0_25, %c0_26], %48 {strides = array<i32>} : memref<1x128xf32, #tpu.memory_space<vmem>>, vector<1x128xf32>,
    return
  }
  func.func @transform_0(%arg0: i32) -> (i32, i32) {
    %c0_i32 = arith.constant 0 : i32
    %c0_i32_0 = arith.constant 0 : i32
    return %arg0, %c0_i32 : i32, i32
  }
  func.func @transform_1(%arg0: i32) -> (i32, i32) {
    %c0_i32 = arith.constant 0 : i32
    %c0_i32_0 = arith.constant 0 : i32
    return %arg0, %c0_i32 : i32, i32
  }
  func.func @transform_2(%arg0: i32) -> (i32, i32) {
    %c0_i32 = arith.constant 0 : i32
    %c0_i32_0 = arith.constant 0 : i32
    %c0_i32_1 = arith.constant 0 : i32
    return %c0_i32, %c0_i32_0 : i32, i32
  }
  func.func @transform_3(%arg0: i32) -> (i32, i32) {
    %c0_i32 = arith.constant 0 : i32
    %c0_i32_0 = arith.constant 0 : i32
    %c0_i32_1 = arith.constant 0 : i32
    return %c0_i32, %c0_i32_0 : i32, i32
  }
  func.func @transform_4(%arg0: i32) -> (i32, i32) {
    %c0_i32 = arith.constant 0 : i32
    %c0_i32_0 = arith.constant 0 : i32
    %c0_i32_1 = arith.constant 0 : i32
    return %c0_i32, %c0_i32_0 : i32, i32
  }
  func.func @transform_5(%arg0: i32) -> (i32, i32) {
    %c0_i32 = arith.constant 0 : i32
    %c0_i32_0 = arith.constant 0 : i32
    %c0_i32_1 = arith.constant 0 : i32
    return %c0_i32, %c0_i32_0 : i32, i32
  }
  func.func @transform_6(%arg0: i32) -> (i32, i32) {
    %c0_i32 = arith.constant 0 : i32
    %c0_i32_0 = arith.constant 0 : i32
    %c0_i32_1 = arith.constant 0 : i32
    return %c0_i32, %c0_i32_0 : i32, i32
  }
  func.func @transform_7(%arg0: i32) -> (i32, i32) {
    %c0_i32 = arith.constant 0 : i32
    %c0_i32_0 = arith.constant 0 : i32
    %c0_i32_1 = arith.constant 0 : i32
    return %c0_i32, %c0_i32_0 : i32, i32
  }
  func.func @transform_8(%arg0: i32) -> (i32, i32) {
    %c0_i32 = arith.constant 0 : i32
    %c0_i32_0 = arith.constant 0 : i32
    %c0_i32_1 = arith.constant 0 : i32
    return %c0_i32, %c0_i32_0 : i32, i32
  }
  func.func @transform_9(%arg0: i32) -> (i32, i32) {
    %c0_i32 = arith.constant 0 : i32
    %c0_i32_0 = arith.constant 0 : i32
    return %c0_i32, %arg0 : i32, i32
  }
}

</mosaic_0001>

<bundles_post_ra>
// kernel: tpu_custom_call.1
= control target key start
LH: loop header
LB: loop body
LE: loop exit
PB: predicated region body
PF: predicated region fallthrough
CT: control target
= control target key end

     0   :  { %s2874_s0 = inlined_call_operand.vmem [shape: f32[256,4], index: 0, kind: input, shape index: {}]   ;;  %s2875_s1 = inlined_call_operand.vmem [shape: f32[256,32], index: 1, kind: input, shape index: {}]   ;;  %s2876_s2 = inlined_call_operand.vmem [shape: f32[32,384], index: 2, kind: input, shape index: {}]   ;;  %s2877_s3 = inlined_call_operand.vmem [shape: f32[1,384], index: 3, kind: input, shape index: {}]   ;;  %s2878_s4 = inlined_call_operand.vmem [shape: f32[128,256], index: 4, kind: input, shape index: {}]   ;;  %s2879_s5 = inlined_call_operand.vmem [shape: f32[1,256], index: 5, kind: input, shape index: {}]   ;;  %s2880_s6 = inlined_call_operand.vmem [shape: f32[4,128], index: 6, kind: input, shape index: {}]   ;;  %s2881_s7 = inlined_call_operand.vmem [shape: f32[1,128], index: 7, kind: input, shape index: {}]   ;;  %s2882_s8 = inlined_call_operand.<no memory space> [shape: f32[1,1], index: 8, kind: input, shape index: {}]   ;;  %s2883_s9 = inlined_call_operand.hbm [shape: f32[1,256], index: 9, kind: output, shape index: {}]  }
   0x1   :  { %14 = sst [smem:[#allocation2]] %s2882_s8 }
   0x2   :  { %15 = vsyncpa [#allocation4], 0 }
   0x3   :  { %17 = vsyncpa [#allocation4 + $0x1], 0  ;;  %s2046_s11 = smov 0   ;;  %s2048_s12 = smov 0  }
   0x4   :  { %s2050_s13 = smov 0   ;;  %s2052_s14 = smov 0  }
   0x5 LB: > { %s1680_s8 = sadd.s32 4294967295, %s1987_s14   ;;  %s1681_s15 = sadd.s32 4294967294, %s1987_s14   ;;  %s1987_s14 = sphi %s2052_s14, %s2925_s14   ;;  %s1983_s13 = sphi %s2050_s13, %s2924_s13   ;;  %s1979_s12 = sphi %s2048_s12, %s2923_s12   ;;  %s1975_s11 = sphi %s2046_s11, %s2922_s11  }
   0x6   : > { %s2069_s16 = sadd.s32 1, %s1987_s14   ;;  %s229_s17 = sadd.s32 1, %s1983_s13 }
   0x7   : > { %s226_s18 = ssub.s32 %s1987_s14, %s2069_s16  ;;  %p239_p0 = scmp.ne.s32.totalorder %s1983_s13, %s1979_s12 }
   0x8   : > { %p227_p1 = scmp.eq.s32.totalorder %s226_s18, 0  ;;  %p240_p2 = scmp.eq.s32.totalorder %s1680_s8, 1 }
   0x9   : > { %p245_p3 = scmp.ne.s32.totalorder %s1979_s12, %s1975_s11  ;;  %p246_p4 = scmp.eq.s32.totalorder %s1681_s15, 1 }
   0xa   : > { %s2079_s19 = scalar_select %p227_p1, %s1983_s13, %s229_s17  }
   0xb   : > { %p2081_p5 = por %p240_p2, %p239_p0  ;;  %p2085_p6 = por %p246_p4, %p245_p3 }
   0xc   : > { %p1684_p7 = scmp.ge.s32.totalorder %s1987_s14, 1  ;;  %p303_p8 = scmp.lt.s32.totalorder %s1987_s14, 3 }
   0xe   : > { %p304_p9 = pnand %p1684_p7, %p303_p8 }
  0x10   : > { %307 = sbr.rel (%p304_p9) target bundleno = 965 (0x3c5), region = 56 }
  0x15   : > { %v397_v0 = vld [vmem:[%s2876_s2 + $0x50] sm:$0xff]  ;;  %v396_v1 = vld [vmem:[%s2876_s2 + $0x48] sm:$0xff]  ;;  %v394_v2 = vld [vmem:[%s2876_s2 + $0x38] sm:$0xff]  ;;  %s2100_s28 = sshll.u32 %s1680_s8, 4  ;;  %v1989_v4 = vmov 0.0   ;;  %vm416_vm0 = vcmask 261120  }
  0x16   : > { %489 = vmatprep.subr.mxu0 %v397_v0  ;;  %v393_v3 = vld [vmem:[%s2876_s2 + $0x30] sm:$0xff]  ;;  %529 = vmatprep.mubr.f32.mxu0 %v1989_v4  ;;  %p344_p10 = scmp.lt.s32.totalorder %s2100_s28, 31  ;;  %v391_v5 = vld [vmem:[%s2876_s2 + $0x20] sm:$0xff]  ;;  %v390_v6 = vld [vmem:[%s2876_s2 + $0x18] sm:$0xff]  ;;  %vm1090_vm1 = vcmask 1043456   ;;  %vm1041_vm2 = vcmask 31744  }
  0x17   : > { %490 = vmatpush1.msra.mxu0 %v396_v1  ;;  %v398_v7 = vld [vmem:[%s2876_s2 + $0x58] sm:$0xff]  ;;  %v395_v8 = vld [vmem:[%s2876_s2 + $0x40] sm:$0xff]  ;;  %v388_v9 = vld [vmem:[%s2876_s2 + $0x8] sm:$0xff]  ;;  %s1990_s25 = smov 64   ;;  %s1991_s26 = smov 32  }
  0x18   : > { %491 = vmatprep.subr.mxu0 %v394_v2  ;;  %s2114_s18 = scalar_select %p344_p10, %s2100_s28, 31  ;;  %1795 = vmatprep.subr.mxu1 %v398_v7  ;;  %v387_v10 = vld [vmem:[%s2876_s2] sm:$0xff]  ;;  %v392_v11 = vld [vmem:[%s2876_s2 + $0x28] sm:$0xff]  ;;  %v389_v14 = vld [vmem:[%s2876_s2 + $0x10] sm:$0xff] }
  0x19   : > { %492 = vmatpush1.msra.mxu0 %v393_v3  ;;  %1796 = vmatpush3.msra.mxu1 %v398_v7  ;;  %v1040_v12 = vld [vmem:[%s2880_s6] sm:$0xf]  ;;  %v834_v16 = vld [vmem:[%s2878_s4 + $0xf8] sm:$0xff]  ;;  %v833_v17 = vld [vmem:[%s2878_s4 + $0xf0] sm:$0xff]  ;;  %s1550_s30 = sld [smem:[#allocation2]]  ;;  %s341_s15 = sand.u32 1, %s1979_s12  }
  0x1a   : > { %493 = vmatprep.subr.mxu0 %v391_v5  ;;  %s1686_s10 = sshll.u32 %s2114_s18, 3  ;;  %1797 = vmatprep.subr.mxu1 %v395_v8  ;;  %v832_v19 = vld [vmem:[%s2878_s4 + $0xe8] sm:$0xff]  ;;  %v831_v20 = vld [vmem:[%s2878_s4 + $0xe0] sm:$0xff]  ;;  %v830_v22 = vld [vmem:[%s2878_s4 + $0xd8] sm:$0xff] }
  0x1b   : > { %494 = vmatpush1.msra.mxu0 %v390_v6  ;;  %s2137_s23 = scalar_lea.vmem %s2875_s1, %s1686_s10  ;;  %1798 = vmatpush3.msra.mxu1 %v395_v8  ;;  %v829_v24 = vld [vmem:[%s2878_s4 + $0xd0] sm:$0xff]  ;;  %v828_v25 = vld [vmem:[%s2878_s4 + $0xc8] sm:$0xff]  ;;  %v827_v26 = vld [vmem:[%s2878_s4 + $0xc0] sm:$0xff]  ;;  %s2307_s17 = scalar_lea.vmem %s2874_s0, %s1686_s10 }
  0x1c   : > { %495 = vmatprep.subr.mxu0 %v388_v9  ;;  %v355_v13 = vld [vmem:[%s2137_s23] sm:$0xff]  ;;  %1799 = vmatprep.subr.mxu1 %v392_v11  ;;  %v356_v15 = vld [vmem:[%s2137_s23 + $0x8] sm:$0xff]  ;;  %v357_v18 = vld [vmem:[%s2137_s23 + $0x10] sm:$0xff]  ;;  %s1612_s10 = scalar_lea.hbm %s2883_s9, %s2100_s28 }
  0x1d   : > { %496 = vmatpush1.msra.mxu0 %v387_v10  ;;  %1800 = vmatpush3.msra.mxu1 %v392_v11  ;;  %v358_v21 = vld [vmem:[%s2137_s23 + $0x18] sm:$0xff]  ;;  %v359_v23 = vld [vmem:[%s2137_s23 + $0x20] sm:$0xff]  ;;  %v360_v27 = vld [vmem:[%s2137_s23 + $0x28] sm:$0xff] }
  0x1e   : > { %1689 = vmatmul.mubr.msk.f32.vlgmr.msra.gmra.mxu0 %vm416_vm0, %v355_v13  ;;  %1827 = vmatprep.subr.msk.mxu0 %vm1090_vm1, %v1040_v12  ;;  %v826_v28 = vld [vmem:[%s2878_s4 + $0xb8] sm:$0xff]  ;;  %v361_v29 = vld [vmem:[%s2137_s23 + $0x30] sm:$0xff]  ;;  %v824_v31 = vld [vmem:[%s2878_s4 + $0xa8] sm:$0xff] }
  0x1f   : > { %535 = vmatprep.mubr.f32.mxu0 %v1989_v4  ;;  %1828 = vmatpush3.msk.msra.mxu0 %vm1090_vm1, %v1040_v12  ;;  %v825_v30 = vld [vmem:[%s2878_s4 + $0xb0] sm:$0xff]  ;;  %v823_v32 = vld [vmem:[%s2878_s4 + $0xa0] sm:$0xff]  ;;  %v362_v33 = vld [vmem:[%s2137_s23 + $0x38] sm:$0xff] }
  0x20   : > { %1803 = vmatprep.mubr.msk.f32.mxu1 %vm416_vm0, %v355_v13  ;;  %1801 = vmatprep.subr.mxu1 %v389_v14  ;;  %v822_v34 = vld [vmem:[%s2878_s4 + $0x98] sm:$0xff]  ;;  %v363_v35 = vld [vmem:[%s2137_s23 + $0x40] sm:$0xff]  ;;  %v821_v36 = vld [vmem:[%s2878_s4 + $0x90] sm:$0xff] }
  0x21   : > { %1802 = vmatpush3.msra.mxu1 %v389_v14  ;;  %v820_v37 = vld [vmem:[%s2878_s4 + $0x88] sm:$0xff]  ;;  %v819_v38 = vld [vmem:[%s2878_s4 + $0x80] sm:$0xff]  ;;  %v818_v40 = vld [vmem:[%s2878_s4 + $0x78] sm:$0xff] }
  0x22   : > { %1690 = vmatmul.mubr.msk.f32.gmra.mxu0 %vm416_vm0, %v356_v15  ;;  %1804 = vmatmul.mubr.msk.f32.vlgmr.msra.gmra.mxu1 %vm416_vm0, %v356_v15  ;;  %v364_v39 = vld [vmem:[%s2137_s23 + $0x48] sm:$0xff]  ;;  %v365_v41 = vld [vmem:[%s2137_s23 + $0x50] sm:$0xff]  ;;  %v815_v44 = vld [vmem:[%s2878_s4 + $0x60] sm:$0xff]  ;;  %v401_v15 = vlaneseq }
  0x23   : > { %541 = vmatprep.mubr.f32.mxu0 %v1989_v4  ;;  %847 = vmatprep.subr.mxu1 %v834_v16  ;;  %v817_v42 = vld [vmem:[%s2878_s4 + $0x70] sm:$0xff]  ;;  %v816_v43 = vld [vmem:[%s2878_s4 + $0x68] sm:$0xff]  ;;  %v366_v45 = vld [vmem:[%s2137_s23 + $0x58] sm:$0xff] }
  0x24   : > { %1806 = vmatprep.mubr.msk.f32.mxu1 %vm416_vm0, %v357_v18  ;;  %848 = vmatpush1.msra.mxu1 %v833_v17  ;;  %v814_v46 = vld [vmem:[%s2878_s4 + $0x58] sm:$0xff]  ;;  %v367_v47 = vld [vmem:[%s2137_s23 + $0x60] sm:$0xff]  ;;  %v813_v48 = vld [vmem:[%s2878_s4 + $0x50] sm:$0xff]  ;;  %v2344_v16 = vshrl.u32 %v401_v15, 7 }
  0x25   : > { %849 = vmatprep.subr.mxu1 %v832_v19  ;;  %v812_v49 = vld [vmem:[%s2878_s4 + $0x48] sm:$0xff]  ;;  %v811_v50 = vld [vmem:[%s2878_s4 + $0x40] sm:$0xff]  ;;  %v810_v52 = vld [vmem:[%s2878_s4 + $0x38] sm:$0xff] }
  0x26   : > { %1691 = vmatmul.mubr.msk.f32.gmra.mxu0 %vm416_vm0, %v357_v18  ;;  %1807 = vmatmul.mubr.msk.f32.gmra.mxu1 %vm416_vm0, %v358_v21  ;;  %v368_v51 = vld [vmem:[%s2137_s23 + $0x68] sm:$0xff]  ;;  %v369_v53 = vld [vmem:[%s2137_s23 + $0x70] sm:$0xff]  ;;  %v807_v56 = vld [vmem:[%s2878_s4 + $0x20] sm:$0xff]  ;;  %v403_v17 = vsub.s32 0, %v2344_v16 }
  0x27   : > { %547 = vmatprep.mubr.f32.mxu0 %v1989_v4  ;;  %850 = vmatpush1.msra.mxu1 %v831_v20  ;;  %v809_v54 = vld [vmem:[%s2878_s4 + $0x30] sm:$0xff]  ;;  %v808_v55 = vld [vmem:[%s2878_s4 + $0x28] sm:$0xff]  ;;  %v370_v57 = vld [vmem:[%s2137_s23 + $0x78] sm:$0xff]  ;;  %s1602_s23 = scalar_lea.sflag [#allocation4], %s341_s15 }
  0x28   : > { %1809 = vmatprep.mubr.msk.f32.mxu1 %vm416_vm0, %v359_v23  ;;  %851 = vmatprep.subr.mxu1 %v830_v22  ;;  %v806_v58 = vld [vmem:[%s2878_s4 + $0x18] sm:$0xff]  ;;  %v805_v59 = vld [vmem:[%s2878_s4 + $0x10] sm:$0xff]  ;;  %v804_v60 = vld [vmem:[%s2878_s4 + $0x8] sm:$0xff] }
  0x29   : > { %852 = vmatpush1.msra.mxu1 %v829_v24  ;;  %v803_v61 = vld [vmem:[%s2878_s4] sm:$0xff]  ;;  %v372_v63 = vld [vmem:[%s2307_s17 + $0x8] sm:$0xff]  ;;  %v373_v0 = vld [vmem:[%s2307_s17 + $0x10] sm:$0xff] }
  0x2a   : > { %1692 = vmatmul.mubr.msk.f32.gmra.mxu0 %vm416_vm0, %v358_v21  ;;  %853 = vmatprep.subr.mxu1 %v828_v25  ;;  %v371_v62 = vld [vmem:[%s2307_s17] sm:$0xff]  ;;  %v374_v1 = vld [vmem:[%s2307_s17 + $0x18] sm:$0xff]  ;;  %v376_v3 = vld [vmem:[%s2307_s17 + $0x28] sm:$0xff] }
  0x2b   : > { %553 = vmatprep.mubr.f32.mxu0 %v1989_v4  ;;  %1810 = vmatmul.mubr.msk.f32.gmra.mxu1 %vm416_vm0, %v360_v27  ;;  %v375_v2 = vld [vmem:[%s2307_s17 + $0x20] sm:$0xff]  ;;  %v377_v5 = vld [vmem:[%s2307_s17 + $0x30] sm:$0xff]  ;;  %v378_v6 = vld [vmem:[%s2307_s17 + $0x38] sm:$0xff] }
  0x2c   : > { %854 = vmatpush1.msra.mxu1 %v827_v26  ;;  %1812 = vmatprep.mubr.msk.f32.mxu1 %vm416_vm0, %v361_v29  ;;  %v379_v7 = vld [vmem:[%s2307_s17 + $0x40] sm:$0xff]  ;;  %v380_v8 = vld [vmem:[%s2307_s17 + $0x48] sm:$0xff]  ;;  %v381_v9 = vld [vmem:[%s2307_s17 + $0x50] sm:$0xff] }
  0x2d   : > { %855 = vmatprep.subr.mxu1 %v826_v28  ;;  %v382_v10 = vld [vmem:[%s2307_s17 + $0x58] sm:$0xff]  ;;  %v383_v11 = vld [vmem:[%s2307_s17 + $0x60] sm:$0xff]  ;;  %v384_v12 = vld [vmem:[%s2307_s17 + $0x68] sm:$0xff] }
  0x2e   : > { %1693 = vmatmul.mubr.msk.f32.gmra.mxu0 %vm416_vm0, %v359_v23  ;;  %856 = vmatpush1.msra.mxu1 %v825_v30  ;;  %v385_v13 = vld [vmem:[%s2307_s17 + $0x70] sm:$0xff]  ;;  %v386_v14 = vld [vmem:[%s2307_s17 + $0x78] sm:$0xff]  ;;  %v2350_v18 = vld [vmem:[%s2877_s3] sm:$0x7]  ;;  %s342_s17 = scalar_lea.vmem [#allocation3], %s341_s15 }
  0x2f   : > { %559 = vmatprep.mubr.f32.mxu0 %v1989_v4  ;;  %857 = vmatprep.subr.mxu1 %v824_v31  ;;  %v2355_v19 = vrot.slane %v2350_v18, %v403_v17  ;;  %s1614_s8 = sshll.u32 %s342_s17, 4  ;;  %s2835_s8 = int_to_ptr.vmem [resolvable:$true] %s1614_s8 }
  0x30   : > { %1813 = vmatmul.mubr.msk.f32.gmra.mxu1 %vm416_vm0, %v362_v33  ;;  %s1927_s24 = scalar_lea.vmem %s2835_s8, 16 }
  0x31   : > { %858 = vmatpush1.msra.mxu1 %v823_v32  ;;  %1815 = vmatprep.mubr.msk.f32.mxu1 %vm416_vm0, %v363_v35  ;;  %p1928_p11 = scmp.ne.s32.totalorder %s2835_s8, %s1927_s24 }
  0x32   : > { %1694 = vmatmul.mubr.msk.f32.gmra.mxu0 %vm416_vm0, %v360_v27  ;;  %859 = vmatprep.subr.mxu1 %v822_v34 }
  0x33   : > { %565 = vmatprep.mubr.f32.mxu0 %v1989_v4  ;;  %860 = vmatpush1.msra.mxu1 %v821_v36  ;;  %p1929_p12 = pnand %p1928_p11, %p2081_p5 }
  0x34   : > { %861 = vmatprep.subr.mxu1 %v820_v37  ;;  %1816 = vmatmul.mubr.msk.f32.gmra.mxu1 %vm416_vm0, %v364_v39 }
  0x35   : > { %862 = vmatpush1.msra.mxu1 %v819_v38  ;;  %1818 = vmatprep.mubr.msk.f32.mxu1 %vm416_vm0, %v365_v41  ;;  %p1930_p13 = pneg %p1929_p12 }
  0x36   : > { %1695 = vmatmul.mubr.msk.f32.gmra.mxu0 %vm416_vm0, %v361_v29  ;;  %863 = vmatprep.subr.mxu1 %v818_v40 }
  0x37   : > { %571 = vmatprep.mubr.f32.mxu0 %v1989_v4  ;;  %864 = vmatpush1.msra.mxu1 %v817_v42 }
  0x38   : > { %865 = vmatprep.subr.mxu1 %v816_v43  ;;  %1819 = vmatmul.mubr.msk.f32.gmra.mxu1 %vm416_vm0, %v366_v45 }
  0x39   : > { %866 = vmatpush1.msra.mxu1 %v815_v44  ;;  %1821 = vmatprep.mubr.msk.f32.mxu1 %vm416_vm0, %v367_v47 }
  0x3a   : > { %1696 = vmatmul.mubr.msk.f32.gmra.mxu0 %vm416_vm0, %v362_v33  ;;  %867 = vmatprep.subr.mxu1 %v814_v46 }
  0x3b   : > { %577 = vmatprep.mubr.f32.mxu0 %v1989_v4  ;;  %868 = vmatpush1.msra.mxu1 %v813_v48 }
  0x3c   : > { %869 = vmatprep.subr.mxu1 %v812_v49  ;;  %1822 = vmatmul.mubr.msk.f32.gmra.mxu1 %vm416_vm0, %v368_v51 }
  0x3d   : > { %870 = vmatpush1.msra.mxu1 %v811_v50  ;;  %1824 = vmatprep.mubr.msk.f32.mxu1 %vm416_vm0, %v369_v53 }
  0x3e   : > { %1697 = vmatmul.mubr.msk.f32.gmra.mxu0 %vm416_vm0, %v363_v35  ;;  %871 = vmatprep.subr.mxu1 %v810_v52 }
  0x3f   : > { %583 = vmatprep.mubr.f32.mxu0 %v1989_v4  ;;  %872 = vmatpush1.msra.mxu1 %v809_v54 }
  0x40   : > { %873 = vmatprep.subr.mxu1 %v808_v55  ;;  %1825 = vmatmul.mubr.msk.f32.gmra.mxu1 %vm416_vm0, %v370_v57 }
  0x41   : > { %874 = vmatpush1.msra.mxu1 %v807_v56  ;;  %911 = vmatprep.mubr.f32.mxu1 %v1989_v4 }
  0x42   : > { %1698 = vmatmul.mubr.msk.f32.gmra.mxu0 %vm416_vm0, %v364_v39  ;;  %875 = vmatprep.subr.mxu1 %v806_v58 }
  0x43   : > { %589 = vmatprep.mubr.f32.mxu0 %v1989_v4  ;;  %876 = vmatpush1.msra.mxu1 %v805_v59 }
  0x44   : > { %877 = vmatprep.subr.mxu1 %v804_v60 }
  0x45   : > { %878 = vmatpush1.msra.mxu1 %v803_v61 }
  0x46   : > { %1699 = vmatmul.mubr.msk.f32.gmra.mxu0 %vm416_vm0, %v365_v41 }
  0x47   : > { %595 = vmatprep.mubr.f32.mxu0 %v1989_v4 }
  0x4a   : > { %1700 = vmatmul.mubr.msk.f32.gmra.mxu0 %vm416_vm0, %v366_v45 }
  0x4b   : > { %601 = vmatprep.mubr.f32.mxu0 %v1989_v4 }
  0x4e   : > { %1701 = vmatmul.mubr.msk.f32.gmra.mxu0 %vm416_vm0, %v367_v47 }
  0x4f   : > { %607 = vmatprep.mubr.f32.mxu0 %v1989_v4 }
  0x52   : > { %1702 = vmatmul.mubr.msk.f32.gmra.mxu0 %vm416_vm0, %v368_v51 }
  0x53   : > { %613 = vmatprep.mubr.f32.mxu0 %v1989_v4 }
  0x56   : > { %1703 = vmatmul.mubr.msk.f32.gmra.mxu0 %vm416_vm0, %v369_v53 }
  0x57   : > { %619 = vmatprep.mubr.f32.mxu0 %v1989_v4 }
  0x5a   : > { %1704 = vmatmul.mubr.msk.f32.gmra.mxu0 %vm416_vm0, %v370_v57 }
  0x5b   : > { %1829 = vmatprep.mubr.msk.f32.mxu0 %vm1041_vm2, %v371_v62 }
  0x5e   : > { %1830 = vmatmul.mubr.msk.f32.vlgmr.msra.gmra.mxu0 %vm1041_vm2, %v372_v63 }
  0x5f   : > { %1832 = vmatprep.mubr.msk.f32.mxu0 %vm1041_vm2, %v373_v0 }
  0x62   : > { %1833 = vmatmul.mubr.msk.f32.gmra.mxu0 %vm1041_vm2, %v374_v1 }
  0x63   : > { %1835 = vmatprep.mubr.msk.f32.mxu0 %vm1041_vm2, %v375_v2 }
  0x66   : > { %1836 = vmatmul.mubr.msk.f32.gmra.mxu0 %vm1041_vm2, %v376_v3 }
  0x67   : > { %1838 = vmatprep.mubr.msk.f32.mxu0 %vm1041_vm2, %v377_v5 }
  0x6a   : > { %1839 = vmatmul.mubr.msk.f32.gmra.mxu0 %vm1041_vm2, %v378_v6 }
  0x6b   : > { %1841 = vmatprep.mubr.msk.f32.mxu0 %vm1041_vm2, %v379_v7 }
  0x6e   : > { %1842 = vmatmul.mubr.msk.f32.gmra.mxu0 %vm1041_vm2, %v380_v8 }
  0x6f   : > { %1844 = vmatprep.mubr.msk.f32.mxu0 %vm1041_vm2, %v381_v9 }
  0x72   : > { %1845 = vmatmul.mubr.msk.f32.gmra.mxu0 %vm1041_vm2, %v382_v10 }
  0x73   : > { %1847 = vmatprep.mubr.msk.f32.mxu0 %vm1041_vm2, %v383_v11 }
  0x76   : > { %1848 = vmatmul.mubr.msk.f32.gmra.mxu0 %vm1041_vm2, %v384_v12 }
  0x77   : > { %1850 = vmatprep.mubr.msk.f32.mxu0 %vm1041_vm2, %v385_v13 }
  0x7a   : > { %1851 = vmatmul.mubr.msk.f32.gmra.mxu0 %vm1041_vm2, %v386_v14 }
  0xde   : > { %v531_v20 = vpop.f32.mrf.mxu0 }
  0xdf   : > { %v532_v21 = vadd.f32 %v531_v20, %v2355_v19 }
  0xe0   : > { %v2358_v22 = vpop.f32.mrf.mxu0 }
  0xe1   : > { %v771_v23 = vmax.f32 %v532_v21, 0.0 }
  0xe2   : > { %v537_v24 = vpop.f32.mrf.mxu0 }
  0xe3   : > { %v538_v25 = vadd.f32 %v537_v24, %v2355_v19  ;;  %912 = vmatmul.mubr.f32.vlgmr.msra.gmra.mxu1 %v771_v23 }
  0xe4   : > { %v2361_v26 = vpop.f32.mrf.mxu0  ;;  %917 = vmatprep.mubr.f32.mxu1 %v1989_v4 }
  0xe5   : > { %v772_v27 = vmax.f32 %v538_v25, 0.0  ;;  %v2418_v25 = vpop.f32.mrf.mxu1 }
  0xe6   : > { %v543_v28 = vpop.f32.mrf.mxu0 }
  0xe7   : > { %v544_v29 = vadd.f32 %v543_v28, %v2355_v19  ;;  %918 = vmatmul.mubr.f32.gmra.mxu1 %v772_v27  ;;  %v2420_v27 = vpop.f32.mrf.mxu1 }
  0xe8   : > { %v2365_v30 = vpop.f32.mrf.mxu0  ;;  %923 = vmatprep.mubr.f32.mxu1 %v1989_v4 }
  0xe9   : > { %v773_v31 = vmax.f32 %v544_v29, 0.0  ;;  %v2422_v28 = vpop.f32.mrf.mxu1 }
  0xea   : > { %v549_v32 = vpop.f32.mrf.mxu0 }
  0xeb   : > { %v550_v33 = vadd.f32 %v549_v32, %v2355_v19  ;;  %924 = vmatmul.mubr.f32.gmra.mxu1 %v773_v31  ;;  %v2424_v29 = vpop.f32.mrf.mxu1 }
  0xec   : > { %v2369_v34 = vpop.f32.mrf.mxu0  ;;  %929 = vmatprep.mubr.f32.mxu1 %v1989_v4 }
  0xed   : > { %v774_v35 = vmax.f32 %v550_v33, 0.0  ;;  %v2426_v31 = vpop.f32.mrf.mxu1 }
  0xee   : > { %v555_v36 = vpop.f32.mrf.mxu0 }
  0xef   : > { %v556_v37 = vadd.f32 %v555_v36, %v2355_v19  ;;  %930 = vmatmul.mubr.f32.gmra.mxu1 %v774_v35  ;;  %v2428_v32 = vpop.f32.mrf.mxu1 }
  0xf0   : > { %v2373_v38 = vpop.f32.mrf.mxu0  ;;  %935 = vmatprep.mubr.f32.mxu1 %v1989_v4 }
  0xf1   : > { %v775_v39 = vmax.f32 %v556_v37, 0.0  ;;  %v2430_v33 = vpop.f32.mrf.mxu1 }
  0xf2   : > { %v561_v40 = vpop.f32.mrf.mxu0 }
  0xf3   : > { %v562_v41 = vadd.f32 %v561_v40, %v2355_v19  ;;  %936 = vmatmul.mubr.f32.gmra.mxu1 %v775_v39 }
  0xf4   : > { %v2377_v42 = vpop.f32.mrf.mxu0  ;;  %941 = vmatprep.mubr.f32.mxu1 %v1989_v4 }
  0xf5   : > { %v776_v43 = vmax.f32 %v562_v41, 0.0 }
  0xf6   : > { %v567_v44 = vpop.f32.mrf.mxu0 }
  0xf7   : > { %v568_v45 = vadd.f32 %v567_v44, %v2355_v19  ;;  %942 = vmatmul.mubr.f32.gmra.mxu1 %v776_v43  ;;  %v2451_v43 = vld [vmem:[%s2879_s5] sm:$0x3] }
  0xf8   : > { %v2381_v46 = vpop.f32.mrf.mxu0  ;;  %947 = vmatprep.mubr.f32.mxu1 %v1989_v4  ;;  %v2456_v44 = vrot.slane %v2451_v43, %v403_v17 }
  0xf9   : > { %v777_v47 = vmax.f32 %v568_v45, 0.0 }
  0xfa   : > { %v573_v48 = vpop.f32.mrf.mxu0 }
  0xfb   : > { %v574_v49 = vadd.f32 %v573_v48, %v2355_v19  ;;  %948 = vmatmul.mubr.f32.gmra.mxu1 %v777_v47 }
  0xfc   : > { %v2385_v50 = vpop.f32.mrf.mxu0  ;;  %953 = vmatprep.mubr.f32.mxu1 %v1989_v4 }
  0xfd   : > { %v778_v51 = vmax.f32 %v574_v49, 0.0 }
  0xfe   : > { %v579_v52 = vpop.f32.mrf.mxu0 }
  0xff   : > { %v580_v53 = vadd.f32 %v579_v52, %v2355_v19  ;;  %954 = vmatmul.mubr.f32.gmra.mxu1 %v778_v51 }
 0x100   : > { %v2389_v54 = vpop.f32.mrf.mxu0  ;;  %959 = vmatprep.mubr.f32.mxu1 %v1989_v4 }
 0x101   : > { %v779_v55 = vmax.f32 %v580_v53, 0.0 }
 0x102   : > { %v585_v56 = vpop.f32.mrf.mxu0 }
 0x103   : > { %v586_v57 = vadd.f32 %v585_v56, %v2355_v19  ;;  %960 = vmatmul.mubr.f32.gmra.mxu1 %v779_v55 }
 0x104   : > { %v2393_v58 = vpop.f32.mrf.mxu0  ;;  %965 = vmatprep.mubr.f32.mxu1 %v1989_v4 }
 0x105   : > { %2888 = vst [vmem:[#allocation6_spill] sm:$0xff] %v2393_v58  ;;  %v780_v59 = vmax.f32 %v586_v57, 0.0 }
 0x106   : > { %v591_v60 = vpop.f32.mrf.mxu0 }
 0x107   : > { %v592_v61 = vadd.f32 %v591_v60, %v2355_v19  ;;  %966 = vmatmul.mubr.f32.gmra.mxu1 %v780_v59 }
 0x108   : > { %v2397_v62 = vpop.f32.mrf.mxu0  ;;  %971 = vmatprep.mubr.f32.mxu1 %v1989_v4 }
 0x109   : > { %2889 = vst [vmem:[#allocation7_spill] sm:$0xff] %v2397_v62  ;;  %v781_v63 = vmax.f32 %v592_v61, 0.0 }
 0x10a   : > { %v597_v0 = vpop.f32.mrf.mxu0 }
 0x10b   : > { %v598_v1 = vadd.f32 %v597_v0, %v2355_v19  ;;  %972 = vmatmul.mubr.f32.gmra.mxu1 %v781_v63 }
 0x10c   : > { %v2401_v2 = vpop.f32.mrf.mxu0  ;;  %977 = vmatprep.mubr.f32.mxu1 %v1989_v4 }
 0x10d   : > { %2890 = vst [vmem:[#allocation8_spill] sm:$0xff] %v2401_v2  ;;  %v782_v3 = vmax.f32 %v598_v1, 0.0 }
 0x10e   : > { %v603_v5 = vpop.f32.mrf.mxu0 }
 0x10f   : > { %v604_v6 = vadd.f32 %v603_v5, %v2355_v19  ;;  %978 = vmatmul.mubr.f32.gmra.mxu1 %v782_v3 }
 0x110   : > { %v2405_v7 = vpop.f32.mrf.mxu0  ;;  %983 = vmatprep.mubr.f32.mxu1 %v1989_v4 }
 0x111   : > { %2891 = vst [vmem:[#allocation9_spill] sm:$0xff] %v2405_v7  ;;  %v783_v8 = vmax.f32 %v604_v6, 0.0 }
 0x112   : > { %v609_v9 = vpop.f32.mrf.mxu0 }
 0x113   : > { %v610_v10 = vadd.f32 %v609_v9, %v2355_v19  ;;  %984 = vmatmul.mubr.f32.gmra.mxu1 %v783_v8 }
 0x114   : > { %v2409_v11 = vpop.f32.mrf.mxu0  ;;  %989 = vmatprep.mubr.f32.mxu1 %v1989_v4 }
 0x115   : > { %2892 = vst [vmem:[#allocation10_spill] sm:$0xff] %v2409_v11  ;;  %v784_v12 = vmax.f32 %v610_v10, 0.0 }
 0x116   : > { %v615_v13 = vpop.f32.mrf.mxu0 }
 0x117   : > { %v616_v14 = vadd.f32 %v615_v13, %v2355_v19  ;;  %990 = vmatmul.mubr.f32.gmra.mxu1 %v784_v12 }
 0x118   : > { %v2413_v15 = vpop.f32.mrf.mxu0  ;;  %995 = vmatprep.mubr.f32.mxu1 %v1989_v4 }
 0x119   : > { %2893 = vst [vmem:[#allocation11_spill] sm:$0xff] %v2413_v15  ;;  %v785_v20 = vmax.f32 %v616_v14, 0.0 }
 0x11a   : > { %v621_v21 = vpop.f32.mrf.mxu0 }
 0x11b   : > { %v622_v23 = vadd.f32 %v621_v21, %v2355_v19  ;;  %996 = vmatmul.mubr.f32.gmra.mxu1 %v785_v20  ;;  %v2432_v19 = vpop.f32.mrf.mxu1 }
 0x11c   : > { %1001 = vmatprep.mubr.f32.mxu1 %v1989_v4  ;;  %v2458_v45 = vpop.f32.mrf.mxu0 }
 0x11d   : > { %v786_v24 = vmax.f32 %v622_v23, 0.0  ;;  %v2434_v35 = vpop.f32.mrf.mxu1  ;;  %2895 = vst [vmem:[#allocation13_spill] sm:$0xff] %v2458_v45 }
 0x11e   : > { %v1831_v49 = vpop.f32.mrf.mxu0 }
 0x11f   : > { %1002 = vmatmul.mubr.f32.gmra.mxu1 %v786_v24  ;;  %v2436_v4 = vpop.f32.mrf.mxu1 }
 0x120   : > { %v1160_v55 = vpop.f32.mrf.mxu0 }
 0x121   : > { %v2438_v36 = vpop.f32.mrf.mxu1 }
 0x122   : > { %v1834_v63 = vpop.f32.mrf.mxu0 }
 0x123   : > { %v2440_v37 = vpop.f32.mrf.mxu1 }
 0x124   : > { %v1170_v6 = vpop.f32.mrf.mxu0 }
 0x125   : > { %v2442_v39 = vpop.f32.mrf.mxu1 }
 0x126   : > { %v1837_v20 = vpop.f32.mrf.mxu0 }
 0x127   : > { %v2444_v40 = vpop.f32.mrf.mxu1 }
 0x129   : > { %v2446_v41 = vpop.f32.mrf.mxu1 }
 0x12a   : > { %2894 = vst [vmem:[#allocation12_spill] sm:$0xff] %v2446_v41 }
 0x12b   : > { %v2460_v47 = vpop.f32.mrf.mxu1 }
 0x12c   : > { %2896 = vst [vmem:[#allocation14_spill] sm:$0xff] %v2460_v47 }
 0x1a3   : > { %v913_v48 = vpop.f32.mrf.mxu1 }
 0x1a4   : > { %v914_v51 = vadd.f32 %v913_v48, %v2456_v44 }
 0x1a5   : > { %v2463_v52 = vpop.f32.mrf.mxu1 }
 0x1a6   : > { %v1008_v53 = vand.u32 2147483647, %v914_v51 }
 0x1a7   : > { %v919_v56 = vpop.f32.mrf.mxu1 }
 0x1a8   : > { %v2465_v57 = vmul.f32 %v1160_v55, %v1008_v53  ;;  %v920_v59 = vadd.f32 %v919_v56, %v2456_v44 }
 0x1a9   : > { %v2468_v60 = vpop.f32.mrf.mxu1 }
 0x1aa   : > { %v1010_v17 = vand.u32 2147483647, %v920_v59  ;;  %1255 = vrot.lane.b32.xlu0 %v2465_v57, %s1990_s25 }
 0x1ab   : > { %v925_v61 = vpop.f32.mrf.mxu1 }
 0x1ac   : > { %v2472_v0 = vmul.f32 %v1831_v49, %v1010_v17  ;;  %v926_v1 = vadd.f32 %v925_v61, %v2456_v44  ;;  %v1180_v49 = vpop.f32.mrf.mxu0 }
 0x1ad   : > { %v2475_v3 = vpop.f32.mrf.mxu1 }
 0x1ae   : > { %v1012_v5 = vand.u32 2147483647, %v926_v1  ;;  %1257 = vrot.lane.b32.xlu0 %v2472_v0, %s1990_s25  ;;  %v1840_v61 = vpop.f32.mrf.mxu0 }
 0x1af   : > { %v931_v8 = vpop.f32.mrf.mxu1 }
 0x1b0   : > { %v2479_v9 = vmul.f32 %v1170_v6, %v1012_v5  ;;  %v932_v10 = vadd.f32 %v931_v8, %v2456_v44  ;;  %v1190_v8 = vpop.f32.mrf.mxu0 }
 0x1b1   : > { %v2482_v12 = vpop.f32.mrf.mxu1 }
 0x1b2   : > { %v1014_v13 = vand.u32 2147483647, %v932_v10  ;;  %1259 = vrot.lane.b32.xlu1 %v2479_v9, %s1990_s25 }
 0x1b3   : > { %v937_v14 = vpop.f32.mrf.mxu1 }
 0x1b4   : > { %v2486_v21 = vmul.f32 %v1834_v63, %v1014_v13  ;;  %v938_v23 = vadd.f32 %v937_v14, %v2456_v44 }
 0x1b5   : > { %v2489_v24 = vpop.f32.mrf.mxu1 }
 0x1b6   : > { %v1016_v48 = vand.u32 2147483647, %v938_v23  ;;  %1261 = vrot.lane.b32.xlu1 %v2486_v21, %s1990_s25 }
 0x1b7   : > { %v943_v51 = vpop.f32.mrf.mxu1 }
 0x1b8   : > { %v2493_v53 = vmul.f32 %v1180_v49, %v1016_v48  ;;  %v944_v55 = vadd.f32 %v943_v51, %v2456_v44  ;;  %v1843_v49 = vpop.f32.mrf.mxu0 }
 0x1b9   : > { %v2496_v56 = vpop.f32.mrf.mxu1 }
 0x1ba   : > { %v1018_v59 = vand.u32 2147483647, %v944_v55  ;;  %1263 = vrot.lane.b32.xlu0 %v2493_v53, %s1990_s25 }
 0x1bb   : > { %v949_v17 = vpop.f32.mrf.mxu1 }
 0x1bc   : > { %v2500_v63 = vmul.f32 %v1837_v20, %v1018_v59  ;;  %v950_v1 = vadd.f32 %v949_v17, %v2456_v44 }
 0x1bd   : > { %v2503_v5 = vpop.f32.mrf.mxu1 }
 0x1be   : > { %v1020_v6 = vand.u32 2147483647, %v950_v1  ;;  %1265 = vrot.lane.b32.xlu1 %v2500_v63, %s1990_s25  ;;  %v1200_v1 = vpop.f32.mrf.mxu0 }
 0x1bf   : > { %v955_v10 = vpop.f32.mrf.mxu1 }
 0x1c0   : > { %v2507_v13 = vmul.f32 %v1190_v8, %v1020_v6  ;;  %v956_v14 = vadd.f32 %v955_v10, %v2456_v44 }
 0x1c1   : > { %v2510_v23 = vpop.f32.mrf.mxu1 }
 0x1c2   : > { %v1022_v48 = vand.u32 2147483647, %v956_v14  ;;  %1267 = vrot.lane.b32.xlu0 %v2507_v13, %s1990_s25 }
 0x1c3   : > { %v961_v20 = vpop.f32.mrf.mxu1 }
 0x1c4   : > { %v2514_v51 = vmul.f32 %v1840_v61, %v1022_v48  ;;  %v962_v55 = vadd.f32 %v961_v20, %v2456_v44  ;;  %v1846_v48 = vpop.f32.mrf.mxu0 }
 0x1c5   : > { %v2517_v59 = vpop.f32.mrf.mxu1 }
 0x1c6   : > { %v1024_v17 = vand.u32 2147483647, %v962_v55  ;;  %1269 = vrot.lane.b32.xlu1 %v2514_v51, %s1990_s25 }
 0x1c7   : > { %v967_v6 = vpop.f32.mrf.mxu1 }
 0x1c8   : > { %v2521_v8 = vmul.f32 %v1200_v1, %v1024_v17  ;;  %v968_v10 = vadd.f32 %v967_v6, %v2456_v44  ;;  %v1210_v17 = vpop.f32.mrf.mxu0 }
 0x1c9   : > { %v2524_v14 = vpop.f32.mrf.mxu1 }
 0x1ca   : > { %2897 = vst [vmem:[#allocation15_spill] sm:$0xff] %v2524_v14  ;;  %v1026_v45 = vand.u32 2147483647, %v968_v10  ;;  %1271 = vrot.lane.b32.xlu0 %v2521_v8, %s1990_s25 }
 0x1cb   : > { %v973_v61 = vpop.f32.mrf.mxu1 }
 0x1cc   : > { %v2528_v20 = vmul.f32 %v1843_v49, %v1026_v45  ;;  %v974_v55 = vadd.f32 %v973_v61, %v2456_v44  ;;  %v1849_v49 = vpop.f32.mrf.mxu0 }
 0x1cd   : > { %v2531_v15 = vpop.f32.mrf.mxu1 }
 0x1ce   : > { %2898 = vst [vmem:[#allocation16_spill] sm:$0xff] %v2531_v15  ;;  %v1028_v11 = vand.u32 2147483647, %v974_v55  ;;  %1273 = vrot.lane.b32.xlu1 %v2528_v20, %s1990_s25 }
 0x1cf   : > { %v979_v1 = vpop.f32.mrf.mxu1 }
 0x1d0   : > { %v2535_v6 = vmul.f32 %v1210_v17, %v1028_v11  ;;  %v980_v10 = vadd.f32 %v979_v1, %v2456_v44  ;;  %v1220_v11 = vpop.f32.mrf.mxu0 }
 0x1d1   : > { %v2538_v7 = vpop.f32.mrf.mxu1 }
 0x1d2   : > { %2899 = vst [vmem:[#allocation17_spill] sm:$0xff] %v2538_v7  ;;  %v1030_v2 = vand.u32 2147483647, %v980_v10  ;;  %1275 = vrot.lane.b32.xlu0 %v2535_v6, %s1990_s25  ;;  %v1852_v47 = vpop.f32.mrf.mxu0 }
 0x1d3   : > { %v985_v45 = vpop.f32.mrf.mxu1 }
 0x1d4   : > { %v1250_v61 = vmul.f32 %v1846_v48, %v1030_v2  ;;  %v986_v55 = vadd.f32 %v985_v45, %v2456_v44 }
 0x1d5   : > { %v2543_v15 = vpop.f32.mrf.mxu1 }
 0x1d6   : > { %2900 = vst [vmem:[#allocation18_spill] sm:$0xff] %v2543_v15  ;;  %v1032_v41 = vand.u32 2147483647, %v986_v55  ;;  %1277 = vrot.lane.b32.xlu1 %v1250_v61, %s1990_s25  ;;  %v1230_v15 = vpop.f32.mrf.mxu0 }
 0x1d7   : > { %v991_v17 = vpop.f32.mrf.mxu1 }
 0x1d8   : > { %v1251_v62 = vmul.f32 %v1220_v11, %v1032_v41  ;;  %v992_v1 = vadd.f32 %v991_v17, %v2456_v44 }
 0x1d9   : > { %v2547_v7 = vpop.f32.mrf.mxu1 }
 0x1da   : > { %2901 = vst [vmem:[#allocation19_spill] sm:$0xff] %v2547_v7  ;;  %v1034_v10 = vand.u32 2147483647, %v992_v1  ;;  %1279 = vrot.lane.b32.xlu0 %v1251_v62, %s1990_s25 }
 0x1db   : > { %v997_v14 = vpop.f32.mrf.mxu1 }
 0x1dc   : > { %v1252_v2 = vmul.f32 %v1849_v49, %v1034_v10  ;;  %v998_v48 = vadd.f32 %v997_v14, %v2456_v44 }
 0x1dd   : > { %v2551_v45 = vpop.f32.mrf.mxu1 }
 0x1de   : > { %2902 = vst [vmem:[#allocation20_spill] sm:$0xff] %v2551_v45  ;;  %v1036_v55 = vand.u32 2147483647, %v998_v48  ;;  %1281 = vrot.lane.b32.xlu1 %v1252_v2, %s1990_s25 }
 0x1df   : > { %v1003_v58 = vpop.f32.mrf.mxu1 }
 0x1e0   : > { %v1253_v41 = vmul.f32 %v1230_v15, %v1036_v55  ;;  %v1004_v11 = vadd.f32 %v1003_v58, %v2456_v44 }
 0x1e2   : > { %v1038_v17 = vand.u32 2147483647, %v1004_v11  ;;  %1283 = vrot.lane.b32.xlu0 %v1253_v41, %s1990_s25 }
 0x1e4   : > { %v1254_v1 = vmul.f32 %v1852_v47, %v1038_v17 }
 0x1e6   : > { %1285 = vrot.lane.b32.xlu1 %v1254_v1, %s1990_s25  ;;  %s1992_s25 = smov [#allocation3]  }
 0x21c   : > { %v1256_v7 = vpop.permute.xlu0 %1255 }
 0x21d   : > { %v1287_v49 = vadd.f32 %v1256_v7, %v2465_v57 }
 0x21f   : > { %1303 = vrot.lane.b32.xlu0 %v1287_v49, %s1991_s26 }
 0x220   : > { %v1258_v14 = vpop.permute.xlu0 %1257 }
 0x221   : > { %v1288_v10 = vadd.f32 %v1258_v14, %v2472_v0 }
 0x223   : > { %1305 = vrot.lane.b32.xlu1 %v1288_v10, %s1991_s26 }
 0x224   : > { %v1260_v15 = vpop.permute.xlu1 %1259 }
 0x225   : > { %v1289_v58 = vadd.f32 %v1260_v15, %v2479_v9 }
 0x227   : > { %1307 = vrot.lane.b32.xlu0 %v1289_v58, %s1991_s26 }
 0x228   : > { %v1262_v44 = vpop.permute.xlu1 %1261 }
 0x229   : > { %v1290_v47 = vadd.f32 %v1262_v44, %v2486_v21 }
 0x22b   : > { %1309 = vrot.lane.b32.xlu1 %v1290_v47, %s1991_s26 }
 0x22c   : > { %v1264_v48 = vpop.permute.xlu0 %1263 }
 0x22d   : > { %v2566_v7 = vadd.f32 %v1264_v48, %v2493_v53 }
 0x22f   : > { %1311 = vrot.lane.b32.xlu0 %v2566_v7, %s1991_s26 }
 0x230   : > { %v1266_v57 = vpop.permute.xlu1 %1265 }
 0x231   : > { %v2571_v0 = vadd.f32 %v1266_v57, %v2500_v63 }
 0x233   : > { %1313 = vrot.lane.b32.xlu1 %v2571_v0, %s1991_s26 }
 0x234   : > { %v1268_v9 = vpop.permute.xlu0 %1267 }
 0x235   : > { %v2576_v55 = vadd.f32 %v1268_v9, %v2507_v13 }
 0x237   : > { %1315 = vrot.lane.b32.xlu0 %v2576_v55, %s1991_s26 }
 0x238   : > { %v1270_v21 = vpop.permute.xlu1 %1269 }
 0x239   : > { %v2581_v53 = vadd.f32 %v1270_v21, %v2514_v51 }
 0x23b   : > { %1317 = vrot.lane.b32.xlu1 %v2581_v53, %s1991_s26 }
 0x23c   : > { %v1272_v11 = vpop.permute.xlu0 %1271 }
 0x23d   : > { %v2586_v63 = vadd.f32 %v1272_v11, %v2521_v8 }
 0x23f   : > { %1319 = vrot.lane.b32.xlu0 %v2586_v63, %s1991_s26 }
 0x240   : > { %v1274_v17 = vpop.permute.xlu1 %1273 }
 0x241   : > { %v2591_v13 = vadd.f32 %v1274_v17, %v2528_v20 }
 0x243   : > { %1321 = vrot.lane.b32.xlu1 %v2591_v13, %s1991_s26 }
 0x244   : > { %v1276_v14 = vpop.permute.xlu0 %1275 }
 0x245   : > { %v2596_v51 = vadd.f32 %v1276_v14, %v2535_v6 }
 0x247   : > { %1323 = vrot.lane.b32.xlu0 %v2596_v51, %s1991_s26 }
 0x248   : > { %v1278_v15 = vpop.permute.xlu1 %1277 }
 0x249   : > { %v2600_v8 = vadd.f32 %v1278_v15, %v1250_v61 }
 0x24b   : > { %1325 = vrot.lane.b32.xlu1 %v2600_v8, %s1991_s26 }
 0x24c   : > { %v1280_v44 = vpop.permute.xlu0 %1279 }
 0x24d   : > { %v2604_v48 = vadd.f32 %v1280_v44, %v1251_v62  ;;  %v411_v62 = vsub.s32 2, %v2344_v16 }
 0x24f   : > { %1327 = vrot.lane.b32.xlu0 %v2604_v48, %s1991_s26 }
 0x250   : > { %v1282_v20 = vpop.permute.xlu1 %1281 }
 0x251   : > { %v2608_v57 = vadd.f32 %v1282_v20, %v1252_v2  ;;  %v2622_v2 = vrot.slane %v2350_v18, %v411_v62 }
 0x253   : > { %1329 = vrot.lane.b32.xlu1 %v2608_v57, %s1991_s26  ;;  %v693_v17 = vadd.f32 %v2420_v27, %v2622_v2  ;;  %v698_v44 = vadd.f32 %v2418_v25, %v2622_v2  ;;  %v703_v62 = vadd.f32 %v2424_v29, %v2622_v2  ;;  %v407_v27 = vsub.s32 1, %v2344_v16 }
 0x254   : > { %v1284_v6 = vpop.permute.xlu0 %1283  ;;  %v708_v25 = vadd.f32 %v2422_v28, %v2622_v2 }
 0x255   : > { %v2612_v9 = vadd.f32 %v1284_v6, %v1253_v41 }
 0x257   : > { %2903 = vst [vmem:[#allocation21_spill] sm:$0xff] %v2612_v9  ;;  %1331 = vrot.lane.b32.xlu0 %v2612_v9, %s1991_s26 }
 0x258   : > { %v1286_v61 = vpop.permute.xlu1 %1285 }
 0x259   : > { %v2616_v21 = vadd.f32 %v1286_v61, %v1254_v1 }
 0x25b   : > { %2904 = vst [vmem:[#allocation22_spill] sm:$0xff] %v2616_v21  ;;  %1333 = vrot.lane.b32.xlu1 %v2616_v21, %s1991_s26  ;;  %s1931_s26 = sshll.u32 %s1992_s25, 4  ;;  %s1932_s26 = int_to_ptr.vmem [resolvable:$false] %s1931_s26 }
 0x25c   : > { %s1933_s27 = scalar_lea.vmem %s1932_s26, 32  ;;  %p1934_p0 = scmp.lt.s32.totalorder %s2835_s8, %s1932_s26 }
 0x25d   : > { %p1935_p1 = scmp.lt.s32.totalorder %s1933_s27, %s1927_s24 }
 0x25f   : > { %p1936_p2 = por %p1935_p1, %p1934_p0 }
 0x261   : > { %p1937_p3 = pnand %p1936_p2, %p1930_p13 }
 0x291   : > { %v1304_v11 = vpop.permute.xlu0 %1303 }
 0x292   : > { %v1335_v41 = vadd.f32 %v1304_v11, %v1287_v49 }
 0x294   : > { %v1351_v14 = vadd.f32 %v1335_v41, %v693_v17 }
 0x295   : > { %v1306_v15 = vpop.permute.xlu1 %1305 }
 0x296   : > { %v1383_v1 = vmin.f32 %v1351_v14, 0.0  ;;  %v1336_v20 = vadd.f32 %v1306_v15, %v1288_v10  ;;  %v2640_v15 = vrot.slane %v2350_v18, %v407_v27  ;;  %vm1367_vm3 = vcmp.gt.f32.partialorder %v1351_v14, 0.0 }
 0x298   : > { %v1399_v6 = vmul.f32 1.442695, %v1383_v1  ;;  %v2628_v61 = vadd.f32 %v1336_v20, %v698_v44  ;;  %v718_v20 = vadd.f32 %v2426_v31, %v2622_v2  ;;  %v723_v31 = vadd.f32 %v2432_v19, %v2622_v2 }
 0x299   : > { %v1308_v45 = vpop.permute.xlu0 %1307 }
 0x29a   : > { %1895 = vpow2.f32 %v1399_v6  ;;  %v1384_v21 = vmin.f32 %v2628_v61, 0.0  ;;  %v1337_v9 = vadd.f32 %v1308_v45, %v1289_v58  ;;  %v2645_v45 = vrot.slane %v2451_v43, %v407_v27  ;;  %v2666_v27 = vld [vmem:[%s2881_s7] ss:$0 sm:$0xff] }
 0x29b   : > { %v713_v58 = vadd.f32 %v2428_v32, %v2622_v2  ;;  %vm1368_vm4 = vcmp.gt.f32.partialorder %v2628_v61, 0.0 }
 0x29c   : > { %v1401_v49 = vmul.f32 1.442695, %v1384_v21  ;;  %v2634_v11 = vadd.f32 %v1337_v9, %v703_v62  ;;  %v916_v1 = vadd.f32 %v2463_v52, %v2645_v45 }
 0x29d   : > { %v1310_v17 = vpop.permute.xlu1 %1309 }
 0x29e   : > { %1897 = vpow2.f32 %v1401_v49  ;;  %v1385_v10 = vmin.f32 %v2634_v11, 0.0  ;;  %v1338_v41 = vadd.f32 %v1310_v17, %v1290_v47  ;;  %v534_v47 = vadd.f32 %v2358_v22, %v2640_v15 }
 0x29f   : > { %v540_v22 = vadd.f32 %v2361_v26, %v2640_v15  ;;  %vm1369_vm5 = vcmp.gt.f32.partialorder %v2634_v11, 0.0 }
 0x2a0   : > { %v1403_v29 = vmul.f32 1.442695, %v1385_v10  ;;  %v2642_v44 = vadd.f32 %v1338_v41, %v708_v25  ;;  %v1009_v25 = vand.u32 2147483647, %v916_v1 }
 0x2a1   : > { %v1312_v16 = vpop.permute.xlu0 %1311 }
 0x2a2   : > { %1899 = vpow2.f32 %v1403_v29  ;;  %v1386_v28 = vmin.f32 %v2642_v44, 0.0  ;;  %v1339_v9 = vadd.f32 %v1312_v16, %v2566_v7  ;;  %v787_v7 = vmax.f32 %v534_v47, 0.0 }
 0x2a3   : > { %v728_v47 = vadd.f32 %v2430_v33, %v2622_v2  ;;  %vm1370_vm6 = vcmp.gt.f32.partialorder %v2642_v44, 0.0 }
 0x2a4   : > { %v1405_v18 = vmul.f32 1.442695, %v1386_v28  ;;  %v2653_v21 = vadd.f32 %v1339_v9, %v713_v58  ;;  %v1486_v58 = vmul.f32 %v2666_v27, %v787_v7  ;;  %v788_v28 = vmax.f32 %v540_v22, 0.0 }
 0x2a5   : > { %v1314_v43 = vpop.permute.xlu1 %1313  ;;  %v546_v9 = vadd.f32 %v2365_v30, %v2640_v15  ;;  %v552_v22 = vadd.f32 %v2369_v34, %v2640_v15 }
 0x2a6   : > { %1901 = vpow2.f32 %v1405_v18  ;;  %v1387_v32 = vmin.f32 %v2653_v21, 0.0  ;;  %v1340_v6 = vadd.f32 %v1314_v43, %v2571_v0  ;;  %v922_v0 = vadd.f32 %v2468_v60, %v2645_v45 }
 0x2a7   : > { %v1896_v62 = vpop.eup %1895  ;;  %v789_v7 = vmax.f32 %v546_v9, 0.0  ;;  %vm1371_vm7 = vcmp.gt.f32.partialorder %v2653_v21, 0.0 }
 0x2a8   : > { %v1407_v52 = vmul.f32 1.442695, %v1387_v32  ;;  %v2668_v49 = vadd.f32 %v1340_v6, %v718_v20  ;;  %v1738_v17 = vadd.f32 -1.0, %v1896_v62  ;;  %v1011_v43 = vand.u32 2147483647, %v922_v0 }
 0x2a9   : > { %v1316_v10 = vpop.permute.xlu0 %1315  ;;  %v1487_v62 = vmul.f32 %v2666_v27, %v788_v28  ;;  %v738_v28 = vadd.f32 %v2434_v35, %v2622_v2 }
 0x2aa   : > { %1903 = vpow2.f32 %v1407_v52  ;;  %v1388_v26 = vmin.f32 %v2668_v49, 0.0  ;;  %v1341_v41 = vadd.f32 %v1316_v10, %v2576_v55  ;;  %v1447_v29 = vsel %vm1367_vm3, %v1351_v14, %v1738_v17 }
 0x2ab   : > { %v1898_v16 = vpop.eup %1897  ;;  %v1463_v19 = vmul.f32 %v1447_v29, %v1009_v25  ;;  %v928_v55 = vadd.f32 %v2475_v3, %v2645_v45  ;;  %v733_v52 = vadd.f32 %v2436_v4, %v2622_v2  ;;  %v1488_v29 = vmul.f32 %v2666_v27, %v789_v7 }
 0x2ac   : > { %v1409_v60 = vmul.f32 1.442695, %v1388_v26  ;;  %v2681_v18 = vadd.f32 %v1341_v41, %v723_v31  ;;  %v1739_v1 = vadd.f32 -1.0, %v1898_v16  ;;  %v790_v16 = vmax.f32 %v552_v22, 0.0 }
 0x2ad   : > { %v1318_v14 = vpop.permute.xlu1 %1317  ;;  %v1502_v20 = vadd.f32 %v1486_v58, %v1463_v19  ;;  %v1013_v0 = vand.u32 2147483647, %v928_v55  ;;  %v558_v58 = vadd.f32 %v2373_v38, %v2640_v15  ;;  %vm1372_vm8 = vcmp.gt.f32.partialorder %v2668_v49, 0.0 }
 0x2ae   : > { %1905 = vpow2.f32 %v1409_v60  ;;  %v1389_v32 = vmin.f32 %v2681_v18, 0.0  ;;  %v1342_v30 = vadd.f32 %v1318_v14, %v2581_v53  ;;  %v1448_v6 = vsel %vm1368_vm4, %v2628_v61, %v1739_v1 }
 0x2af   : > { %v1900_v33 = vpop.eup %1899  ;;  %1518 = vadd.xlane.f32.xlu0 %v1502_v20  ;;  %v1464_v3 = vmul.f32 %v1448_v6, %v1011_v43  ;;  %v934_v53 = vadd.f32 %v2482_v12, %v2645_v45  ;;  %v1489_v14 = vmul.f32 %v2666_v27, %v790_v16  ;;  %v791_v20 = vmax.f32 %v558_v58, 0.0 }
 0x2b0   : > { %v1411_v17 = vmul.f32 1.442695, %v1389_v32  ;;  %v2694_v31 = vadd.f32 %v1342_v30, %v728_v47  ;;  %v1740_v25 = vadd.f32 -1.0, %v1900_v33  ;;  %v564_v32 = vadd.f32 %v2377_v42, %v2640_v15 }
 0x2b1   : > { %v1320_v61 = vpop.permute.xlu0 %1319  ;;  %v1503_v10 = vadd.f32 %v1487_v62, %v1464_v3  ;;  %v1015_v60 = vand.u32 2147483647, %v934_v53  ;;  %v743_v30 = vadd.f32 %v2440_v37, %v2622_v2  ;;  %v748_v53 = vadd.f32 %v2438_v36, %v2622_v2 }
 0x2b2   : > { %1907 = vpow2.f32 %v1411_v17  ;;  %v1390_v34 = vmin.f32 %v2694_v31, 0.0  ;;  %v1343_v26 = vadd.f32 %v1320_v61, %v2586_v63  ;;  %v1449_v41 = vsel %vm1369_vm5, %v2634_v11, %v1740_v25 }
 0x2b3   : > { %v1902_v4 = vpop.eup %1901  ;;  %1520 = vadd.xlane.f32.xlu1 %v1503_v10  ;;  %v1465_v12 = vmul.f32 %v1449_v41, %v1013_v0  ;;  %v940_v63 = vadd.f32 %v2489_v24, %v2645_v45  ;;  %v1490_v17 = vmul.f32 %v2666_v27, %v791_v20  ;;  %v792_v25 = vmax.f32 %v564_v32, 0.0 }
 0x2b4   : > { %v1413_v9 = vmul.f32 1.442695, %v1390_v34  ;;  %v2707_v19 = vadd.f32 %v1343_v26, %v733_v52  ;;  %v1741_v47 = vadd.f32 -1.0, %v1902_v4  ;;  %v570_v0 = vadd.f32 %v2381_v46, %v2640_v15 }
 0x2b5   : > { %v1322_v11 = vpop.permute.xlu1 %1321  ;;  %v1504_v1 = vadd.f32 %v1488_v29, %v1465_v12  ;;  %v1017_v7 = vand.u32 2147483647, %v940_v63  ;;  %v1491_v16 = vmul.f32 %v2666_v27, %v792_v25  ;;  %v576_v12 = vadd.f32 %v2385_v50, %v2640_v15 }
 0x2b6   : > { %1909 = vpow2.f32 %v1413_v9  ;;  %v1391_v38 = vmin.f32 %v2707_v19, 0.0  ;;  %v1344_v43 = vadd.f32 %v1322_v11, %v2591_v13  ;;  %v1450_v55 = vsel %vm1370_vm6, %v2642_v44, %v1741_v47 }
 0x2b7   : > { %v1904_v35 = vpop.eup %1903  ;;  %1522 = vadd.xlane.f32.xlu0 %v1504_v1  ;;  %v1466_v24 = vmul.f32 %v1450_v55, %v1015_v60  ;;  %v946_v13 = vadd.f32 %v2496_v56, %v2645_v45  ;;  %v793_v58 = vmax.f32 %v570_v0, 0.0  ;;  %vm1373_vm9 = vcmp.gt.f32.partialorder %v2681_v18, 0.0 }
 0x2b8   : > { %v1415_v6 = vmul.f32 1.442695, %v1391_v38  ;;  %v2720_v33 = vadd.f32 %v1344_v43, %v738_v28  ;;  %v1742_v62 = vadd.f32 -1.0, %v1904_v35  ;;  %v753_v28 = vadd.f32 %v2444_v40, %v2622_v2 }
 0x2b9   : > { %v1324_v44 = vpop.permute.xlu0 %1323  ;;  %v1505_v22 = vadd.f32 %v1489_v14, %v1466_v24  ;;  %v1019_v26 = vand.u32 2147483647, %v946_v13  ;;  %v1492_v43 = vmul.f32 %v2666_v27, %v793_v58  ;;  %v794_v55 = vmax.f32 %v576_v12, 0.0 }
 0x2ba   : > { %1911 = vpow2.f32 %v1415_v6  ;;  %v1392_v42 = vmin.f32 %v2720_v33, 0.0  ;;  %v1345_v3 = vadd.f32 %v1324_v44, %v2596_v51  ;;  %v1451_v52 = vsel %vm1371_vm7, %v2653_v21, %v1742_v62 }
 0x2bb   : > { %v1906_v37 = vpop.eup %1905  ;;  %1524 = vadd.xlane.f32.xlu0 %v1505_v22  ;;  %v1467_v56 = vmul.f32 %v1451_v52, %v1017_v7  ;;  %v952_v51 = vadd.f32 %v2503_v5, %v2645_v45  ;;  %v582_v35 = vadd.f32 %v2389_v54, %v2640_v15  ;;  %v758_v14 = vadd.f32 %v2442_v39, %v2622_v2  ;;  %v2905_v22 = vld [vmem:[#allocation6_spill] sm:$0xff] }
 0x2bc   : > { %v1417_v61 = vmul.f32 1.442695, %v1392_v42  ;;  %v2733_v10 = vadd.f32 %v1345_v3, %v743_v30  ;;  %v1743_v34 = vadd.f32 -1.0, %v1906_v37  ;;  %vm1374_vm10 = vcmp.gt.f32.partialorder %v2694_v31, 0.0  ;;  %v2906_v3 = vld [vmem:[#allocation14_spill] sm:$0xff] }
 0x2bd   : > { %v1326_v21 = vpop.permute.xlu1 %1325  ;;  %v1506_v41 = vadd.f32 %v1490_v17, %v1467_v56  ;;  %v1021_v63 = vand.u32 2147483647, %v952_v51  ;;  %v1493_v13 = vmul.f32 %v2666_v27, %v794_v55  ;;  %v795_v44 = vmax.f32 %v582_v35, 0.0 }
 0x2be   : > { %1913 = vpow2.f32 %v1417_v61  ;;  %v1393_v46 = vmin.f32 %v2733_v10, 0.0  ;;  %v1346_v4 = vadd.f32 %v1326_v21, %v2600_v8  ;;  %v1452_v29 = vsel %vm1372_vm8, %v2668_v49, %v1743_v34  ;;  %v2908_v34 = vld [vmem:[#allocation21_spill] sm:$0xff] }
 0x2bf   : > { %v1908_v36 = vpop.eup %1907  ;;  %1526 = vadd.xlane.f32.xlu1 %v1506_v41  ;;  %v1468_v5 = vmul.f32 %v1452_v29, %v1019_v26  ;;  %v958_v8 = vadd.f32 %v2510_v23, %v2645_v45  ;;  %v588_v42 = vadd.f32 %v2905_v22, %v2640_v15  ;;  %v763_v52 = vadd.f32 %v2906_v3, %v2622_v2  ;;  %v2916_v3 = vld [vmem:[#allocation18_spill] sm:$0xff] }
 0x2c0   : > { %v1419_v9 = vmul.f32 1.442695, %v1393_v46  ;;  %v2746_v47 = vadd.f32 %v1346_v4, %v748_v53  ;;  %v1744_v60 = vadd.f32 -1.0, %v1908_v36  ;;  %vm1375_vm11 = vcmp.gt.f32.partialorder %v2707_v19, 0.0  ;;  %v2909_v4 = vld [vmem:[#allocation7_spill] sm:$0xff] }
 0x2c1   : > { %v1328_v49 = vpop.permute.xlu0 %1327  ;;  %v1507_v11 = vadd.f32 %v1491_v16, %v1468_v5  ;;  %v1023_v30 = vand.u32 2147483647, %v958_v8  ;;  %v1494_v41 = vmul.f32 %v2666_v27, %v795_v44  ;;  %v796_v46 = vmax.f32 %v588_v42, 0.0  ;;  %v2910_v16 = vld [vmem:[#allocation12_spill] sm:$0xff] }
 0x2c2   : > { %1915 = vpow2.f32 %v1419_v9  ;;  %v1394_v50 = vmin.f32 %v2746_v47, 0.0  ;;  %v1347_v1 = vadd.f32 %v1328_v49, %v2604_v48  ;;  %v1453_v38 = vsel %vm1373_vm9, %v2681_v18, %v1744_v60  ;;  %v2911_v60 = vld [vmem:[#allocation16_spill] sm:$0xff] }
 0x2c3   : > { %v1910_v40 = vpop.eup %1909  ;;  %1528 = vadd.xlane.f32.xlu0 %v1507_v11  ;;  %v1469_v23 = vmul.f32 %v1453_v38, %v1021_v63  ;;  %v964_v48 = vadd.f32 %v2517_v59, %v2645_v45  ;;  %v594_v29 = vadd.f32 %v2909_v4, %v2640_v15  ;;  %v768_v58 = vadd.f32 %v2910_v16, %v2622_v2  ;;  %v2912_v11 = vld [vmem:[#allocation22_spill] sm:$0xff] }
 0x2c4   : > { %v1421_v20 = vmul.f32 1.442695, %v1394_v50  ;;  %v2759_v32 = vadd.f32 %v1347_v1, %v753_v28  ;;  %v1745_v24 = vadd.f32 -1.0, %v1910_v40  ;;  %vm1376_vm12 = vcmp.gt.f32.partialorder %v2720_v33, 0.0 }
 0x2c5   : > { %v1330_v18 = vpop.permute.xlu1 %1329  ;;  %v1508_v6 = vadd.f32 %v1492_v43, %v1469_v23  ;;  %v1025_v0 = vand.u32 2147483647, %v964_v48  ;;  %v1495_v38 = vmul.f32 %v2666_v27, %v796_v46  ;;  %v797_v40 = vmax.f32 %v594_v29, 0.0  ;;  %v2913_v43 = vld [vmem:[#allocation8_spill] sm:$0xff]  ;;  %v2919_v29 = vld [vmem:[#allocation11_spill] sm:$0xff] }
 0x2c6   : > { %1917 = vpow2.f32 %v1421_v20  ;;  %v1395_v54 = vmin.f32 %v2759_v32, 0.0  ;;  %v1348_v62 = vadd.f32 %v1330_v18, %v2608_v57  ;;  %v1454_v7 = vsel %vm1374_vm10, %v2694_v31, %v1745_v24  ;;  %v2907_v57 = vld [vmem:[#allocation15_spill] sm:$0xff] }
 0x2c7   : > { %v1912_v39 = vpop.eup %1911  ;;  %1530 = vadd.xlane.f32.xlu1 %v1508_v6  ;;  %v1470_v59 = vmul.f32 %v1454_v7, %v1023_v30  ;;  %v970_v31 = vadd.f32 %v2907_v57, %v2645_v45  ;;  %v600_v55 = vadd.f32 %v2913_v43, %v2640_v15  ;;  %v2914_v30 = vld [vmem:[#allocation17_spill] sm:$0xff]  ;;  %vm1377_vm13 = vcmp.gt.f32.partialorder %v2733_v10, 0.0 }
 0x2c8   : > { %v1423_v37 = vmul.f32 1.442695, %v1395_v54  ;;  %v2772_v17 = vadd.f32 %v1348_v62, %v758_v14  ;;  %v1746_v25 = vadd.f32 -1.0, %v1912_v39  ;;  %v982_v48 = vadd.f32 %v2914_v30, %v2645_v45  ;;  %v2915_v39 = vld [vmem:[#allocation9_spill] sm:$0xff] }
 0x2c9   : > { %v1332_v56 = vpop.permute.xlu0 %1331  ;;  %v1509_v53 = vadd.f32 %v1493_v13, %v1470_v59  ;;  %v1027_v9 = vand.u32 2147483647, %v970_v31  ;;  %v1496_v62 = vmul.f32 %v2666_v27, %v797_v40  ;;  %v798_v7 = vmax.f32 %v600_v55, 0.0  ;;  %v2917_v31 = vld [vmem:[#allocation10_spill] sm:$0xff] }
 0x2ca   : > { %1919 = vpow2.f32 %v1423_v37  ;;  %v1396_v61 = vmin.f32 %v2772_v17, 0.0  ;;  %v1349_v26 = vadd.f32 %v1332_v56, %v2908_v34  ;;  %v1455_v51 = vsel %vm1375_vm11, %v2707_v19, %v1746_v25 }
 0x2cb   : > { %v1914_v21 = vpop.eup %1913  ;;  %1532 = vadd.xlane.f32.xlu0 %v1509_v53  ;;  %v1471_v36 = vmul.f32 %v1455_v51, %v1025_v0  ;;  %v976_v19 = vadd.f32 %v2911_v60, %v2645_v45  ;;  %v606_v13 = vadd.f32 %v2915_v39, %v2640_v15  ;;  %v1031_v59 = vand.u32 2147483647, %v982_v48 }
 0x2cc   : > { %v1425_v12 = vmul.f32 1.442695, %v1396_v61  ;;  %v2785_v5 = vadd.f32 %v1349_v26, %v763_v52  ;;  %v1747_v28 = vadd.f32 -1.0, %v1914_v21  ;;  %v988_v52 = vadd.f32 %v2916_v3, %v2645_v45  ;;  %v2918_v26 = vld [vmem:[#allocation19_spill] sm:$0xff] }
 0x2cd   : > { %v1334_v63 = vpop.permute.xlu1 %1333  ;;  %v1510_v8 = vadd.f32 %v1494_v41, %v1471_v36  ;;  %v1029_v24 = vand.u32 2147483647, %v976_v19  ;;  %vm1378_vm14 = vcmp.gt.f32.partialorder %v2746_v47, 0.0  ;;  %v1497_v0 = vmul.f32 %v2666_v27, %v798_v7  ;;  %v1005_v19 = vpop.f32.mrf.mxu1 }
 0x2ce   : > { %1921 = vpow2.f32 %v1425_v12  ;;  %v1397_v49 = vmin.f32 %v2785_v5, 0.0  ;;  %v1350_v50 = vadd.f32 %v1334_v63, %v2912_v11  ;;  %v1456_v1 = vsel %vm1376_vm12, %v2720_v33, %v1747_v28  ;;  %v2920_v28 = vld [vmem:[#allocation20_spill] sm:$0xff]  ;;  %v2921_v11 = vld [vmem:[#allocation13_spill] sm:$0xff] }
 0x2cf   : > { %v1916_v2 = vpop.eup %1915  ;;  %1534 = vadd.xlane.f32.xlu1 %v1510_v8  ;;  %v1472_v35 = vmul.f32 %v1456_v1, %v1027_v9  ;;  %v799_v57 = vmax.f32 %v606_v13, 0.0  ;;  %v612_v56 = vadd.f32 %v2917_v31, %v2640_v15  ;;  %v1033_v34 = vand.u32 2147483647, %v988_v52 }
 0x2d0   : > { %v1427_v23 = vmul.f32 1.442695, %v1397_v49  ;;  %v2796_v14 = vadd.f32 %v1350_v50, %v768_v58  ;;  %v1748_v20 = vadd.f32 -1.0, %v1916_v2  ;;  %v994_v51 = vadd.f32 %v2918_v26, %v2645_v45 }
 0x2d1   : > { %v1511_v18 = vadd.f32 %v1495_v38, %v1472_v35  ;;  %vm1379_vm15 = vcmp.gt.f32.partialorder %v2759_v32, 0.0  ;;  %v1498_v46 = vmul.f32 %v2666_v27, %v799_v57  ;;  %v800_v4 = vmax.f32 %v612_v56, 0.0 }
 0x2d2   : > { %1923 = vpow2.f32 %v1427_v23  ;;  %v1398_v33 = vmin.f32 %v2796_v14, 0.0  ;;  %v1457_v6 = vsel %vm1377_vm13, %v2733_v10, %v1748_v20  ;;  %v618_v36 = vadd.f32 %v2919_v29, %v2640_v15 }
 0x2d3   : > { %v1918_v54 = vpop.eup %1917  ;;  %1536 = vadd.xlane.f32.xlu0 %v1511_v18  ;;  %v1473_v44 = vmul.f32 %v1457_v6, %v1029_v24  ;;  %v1035_v12 = vand.u32 2147483647, %v994_v51  ;;  %v1000_v9 = vadd.f32 %v2920_v28, %v2645_v45  ;;  %vm1380_vm0 = vcmp.gt.f32.partialorder %v2772_v17, 0.0 }
 0x2d4   : > { %v1429_v22 = vmul.f32 1.442695, %v1398_v33  ;;  %v1749_v42 = vadd.f32 -1.0, %v1918_v54  ;;  %v1499_v8 = vmul.f32 %v2666_v27, %v800_v4  ;;  %v801_v49 = vmax.f32 %v618_v36, 0.0 }
 0x2d5   : > { %v1512_v37 = vadd.f32 %v1496_v62, %v1473_v44  ;;  %v624_v50 = vadd.f32 %v2921_v11, %v2640_v15  ;;  %v1037_v38 = vand.u32 2147483647, %v1000_v9  ;;  %v1006_v40 = vadd.f32 %v1005_v19, %v2645_v45 }
 0x2d6   : > { %1925 = vpow2.f32 %v1429_v22  ;;  %v1458_v10 = vsel %vm1378_vm14, %v2746_v47, %v1749_v42  ;;  %vm1381_vm1 = vcmp.gt.f32.partialorder %v2785_v5, 0.0  ;;  %vm1382_vm2 = vcmp.gt.f32.partialorder %v2796_v14, 0.0 }
 0x2d7   : > { %v1920_v25 = vpop.eup %1919  ;;  %1538 = vadd.xlane.f32.xlu1 %v1512_v37  ;;  %v1474_v53 = vmul.f32 %v1458_v10, %v1031_v59  ;;  %v802_v23 = vmax.f32 %v624_v50, 0.0  ;;  %v1039_v30 = vand.u32 2147483647, %v1006_v40 }
 0x2d8   : > { %v1750_v61 = vadd.f32 -1.0, %v1920_v25 }
 0x2d9   : > { %v1513_v21 = vadd.f32 %v1497_v0, %v1474_v53  ;;  %v1501_v45 = vmul.f32 %v2666_v27, %v802_v23 }
 0x2da   : > { %v1459_v41 = vsel %vm1379_vm15, %v2759_v32, %v1750_v61 }
 0x2db   : > { %v1922_v47 = vpop.eup %1921  ;;  %1540 = vadd.xlane.f32.xlu0 %v1513_v21  ;;  %v1475_v16 = vmul.f32 %v1459_v41, %v1033_v34 }
 0x2dc   : > { %v1751_v58 = vadd.f32 -1.0, %v1922_v47 }
 0x2dd   : > { %v1514_v60 = vadd.f32 %v1498_v46, %v1475_v16 }
 0x2de   : > { %v1460_v32 = vsel %vm1380_vm0, %v2772_v17, %v1751_v58  ;;  %v1500_v17 = vmul.f32 %v2666_v27, %v801_v49 }
 0x2df   : > { %v1924_v63 = vpop.eup %1923  ;;  %1542 = vadd.xlane.f32.xlu1 %v1514_v60  ;;  %v1476_v1 = vmul.f32 %v1460_v32, %v1035_v12 }
 0x2e0   : > { %v1752_v2 = vadd.f32 -1.0, %v1924_v63 }
 0x2e1   : > { %v1515_v43 = vadd.f32 %v1499_v8, %v1476_v1 }
 0x2e2   : > { %v1461_v55 = vsel %vm1381_vm1, %v2785_v5, %v1752_v2  ;;  %v1551_v5 = vstv %s1550_s30 }
 0x2e3   : > { %v1926_v35 = vpop.eup %1925  ;;  %1544 = vadd.xlane.f32.xlu0 %v1515_v43  ;;  %v1477_v20 = vmul.f32 %v1461_v55, %v1037_v38 }
 0x2e4   : > { %v1753_v24 = vadd.f32 -1.0, %v1926_v35 }
 0x2e5   : > { %v1516_v15 = vadd.f32 %v1500_v17, %v1477_v20 }
 0x2e6   : > { %v1462_v48 = vsel %vm1382_vm2, %v2796_v14, %v1753_v24 }
 0x2e7   : > { %1546 = vadd.xlane.f32.xlu1 %v1516_v15  ;;  %v1478_v18 = vmul.f32 %v1462_v48, %v1039_v30 }
 0x2e9   : > { %v1517_v33 = vadd.f32 %v1501_v45, %v1478_v18 }
 0x2eb   : > { %1548 = vadd.xlane.f32.xlu0 %v1517_v33 }
 0x338   : > { %v1519_v6 = vpop.xlane.xlu0 %1518 }
 0x339   : > { %v1552_v54 = vadd.f32 %v1551_v5, %v1519_v6 }
 0x33b   : > { %1568 = vxpose.xlu1.b32.start [1/16] (narrow) %v1552_v54, 8 }
 0x33c   : > { %v1521_v62 = vpop.xlane.xlu1 %1520 }
 0x33d   : > { %v1553_v7 = vadd.f32 %v1551_v5, %v1521_v62 }
 0x33f   : > { %1569 = vxpose.xlu1.b32.cont [2/16] (narrow) %v1553_v7, 8 }
 0x340   : > { %v1523_v39 = vpop.xlane.xlu0 %1522 }
 0x341   : > { %v1554_v13 = vadd.f32 %v1551_v5, %v1523_v39 }
 0x343   : > { %1570 = vxpose.xlu1.b32.cont [3/16] (narrow) %v1554_v13, 8 }
 0x344   : > { %v1525_v44 = vpop.xlane.xlu0 %1524 }
 0x345   : > { %v1555_v22 = vadd.f32 %v1551_v5, %v1525_v44 }
 0x347   : > { %1571 = vxpose.xlu1.b32.cont [4/16] (narrow) %v1555_v22, 8 }
 0x348   : > { %v1527_v14 = vpop.xlane.xlu1 %1526 }
 0x349   : > { %v1556_v27 = vadd.f32 %v1551_v5, %v1527_v14 }
 0x34b   : > { %1572 = vxpose.xlu1.b32.cont [5/16] (narrow) %v1556_v27, 8 }
 0x34c   : > { %v1529_v42 = vpop.xlane.xlu0 %1528 }
 0x34d   : > { %v1557_v59 = vadd.f32 %v1551_v5, %v1529_v42 }
 0x34f   : > { %1573 = vxpose.xlu1.b32.cont [6/16] (narrow) %v1557_v59, 8 }
 0x350   : > { %v1531_v3 = vpop.xlane.xlu1 %1530 }
 0x351   : > { %v1558_v52 = vadd.f32 %v1551_v5, %v1531_v3 }
 0x353   : > { %1574 = vxpose.xlu1.b32.cont [7/16] (narrow) %v1558_v52, 8 }
 0x354   : > { %v1533_v37 = vpop.xlane.xlu0 %1532 }
 0x355   : > { %v1559_v10 = vadd.f32 %v1551_v5, %v1533_v37 }
 0x357   : > { %1575 = vxpose.xlu1.b32.cont [8/16] (narrow) %v1559_v10, 8 }
 0x358   : > { %v1535_v25 = vpop.xlane.xlu1 %1534 }
 0x359   : > { %v1560_v0 = vadd.f32 %v1551_v5, %v1535_v25 }
 0x35b   : > { %1576 = vxpose.xlu1.b32.cont [9/16] (narrow) %v1560_v0, 8 }
 0x35c   : > { %v1537_v57 = vpop.xlane.xlu0 %1536 }
 0x35d   : > { %v1561_v31 = vadd.f32 %v1551_v5, %v1537_v57 }
 0x35f   : > { %1577 = vxpose.xlu1.b32.cont [10/16] (narrow) %v1561_v31, 8 }
 0x360   : > { %v1539_v56 = vpop.xlane.xlu1 %1538 }
 0x361   : > { %v1562_v53 = vadd.f32 %v1551_v5, %v1539_v56 }
 0x363   : > { %1578 = vxpose.xlu1.b32.cont [11/16] (narrow) %v1562_v53, 8 }
 0x364   : > { %v1541_v61 = vpop.xlane.xlu0 %1540 }
 0x365   : > { %v1563_v34 = vadd.f32 %v1551_v5, %v1541_v61 }
 0x367   : > { %1579 = vxpose.xlu1.b32.cont [12/16] (narrow) %v1563_v34, 8 }
 0x368   : > { %v1543_v26 = vpop.xlane.xlu1 %1542 }
 0x369   : > { %v1564_v51 = vadd.f32 %v1551_v5, %v1543_v26 }
 0x36b   : > { %1580 = vxpose.xlu1.b32.cont [13/16] (narrow) %v1564_v51, 8 }
 0x36c   : > { %v1545_v21 = vpop.xlane.xlu0 %1544 }
 0x36d   : > { %v1565_v41 = vadd.f32 %v1551_v5, %v1545_v21 }
 0x36f   : > { %1581 = vxpose.xlu1.b32.cont [14/16] (narrow) %v1565_v41, 8 }
 0x370   : > { %v1547_v47 = vpop.xlane.xlu1 %1546 }
 0x371   : > { %v1566_v46 = vadd.f32 %v1551_v5, %v1547_v47 }
 0x373   : > { %1582 = vxpose.xlu1.b32.cont [15/16] (narrow) %v1566_v46, 8 }
 0x374   : > { %v1549_v4 = vpop.xlane.xlu0 %1548 }
 0x375   : > { %v1567_v29 = vadd.f32 %v1551_v5, %v1549_v4 }
 0x377   : > { %1583 = vxpose.xlu1.b32.end [16/16] (narrow) %v1567_v29, 8 }
 0x3b7   : > { %v1584_v36 = vpop.trf.xlu1 }
 0x3b8   : > { %1600 = vst [vmem:[%s342_s17] sm:$0x1] %v1584_v36 }
 0x3b9   : > { %1940 = shalt.err (!%p1937_p3)
}
 0x3ba   : > { %s1941_s29 = scalar_lea.hbm %s1612_s10, 16  ;;  %s1945_s15 = scalar_lea.hbm %s2883_s9, 32 }
 0x3bb   : > { %p1942_p4 = scmp.ne.s32.totalorder %s1612_s10, %s1941_s29  ;;  %p1946_p9 = scmp.lt.s32.totalorder %s1612_s10, %s2883_s9 }
 0x3bc   : > { %p1947_p10 = scmp.lt.s32.totalorder %s1945_s15, %s1941_s29 }
 0x3bd   : > { %p1943_p7 = pnand %p1942_p4, %p2081_p5 }
 0x3be   : > { %p1948_p11 = por %p1947_p10, %p1946_p9 }
 0x3bf   : > { %p1944_p8 = pneg %p1943_p7 }
 0x3c1   : > { %p1949_p12 = pnand %p1948_p11, %p1944_p8 }
 0x3c3   : > { %1952 = shalt.err (!%p1949_p12)
}
 0x3c4   : > { %1853 = dma.vmem_to_hbm [thread:$0]  (%p2081_p5), %s2835_s8, 16, %s1612_s10, %s1602_s23  }
 0x3c5 PF: > { %p1859_p13 = scmp.ge.s32.totalorder %s1987_s14, 2  ;;  %s1626_s18 = sand.u32 1, %s1975_s11  }
 0x3c6   : > { %s1627_s24 = scalar_lea.sflag [#allocation4], %s1626_s18 }
 0x3c7   : > { %p1856_p0 = pnand %p1859_p13, %p2085_p6 }
 0x3c9   : > { %p1857_p1 = pneg %p1856_p0 }
 0x3cb   : > { %1970 = dma.done.wait (%p1857_p1), %s1627_s24, 16  }
 0x3cc   : > { %1972 = vsyncadd (%p1857_p1), %s1627_s24, 4294967280  ;;  %p20_p2 = scmp.ge.s32.totalorder %s2069_s16, 4   ;;  %s2922_s11 = smov %s1979_s12 }
 0x3cd   : > { %s2923_s12 = smov %s1983_s13  ;;  %s2924_s13 = smov %s2079_s19 }
 0x3ce   : > { %s2925_s14 = smov %s2069_s16  ;;  %22 = sbr.rel (!%p20_p2) target bundleno = 5 (0x5), region = 94 }
 0x3d3   :  { %1631 = vsyncpa [#allocation4], 1 }
 0x3d4   :  { %1633 = vsyncpa [#allocation4 + $0x1], 1 }

</bundles_post_ra>
